<compile_context>
chip_gen: v5e
topology: v5e:2x2
jax: 0.10.0
libtpu: 0.0.40
codegen_flags: <defaults>
</compile_context>

<pallas_src>
import functools

import jax
import jax.numpy as jnp
from jax import lax
from jax.experimental import pallas as pl
from jax.experimental.pallas import tpu as pltpu

EPS = 1e-5  # nn.BatchNorm2d default


def _resblock_kernel(H, W, x_ref, w1_ref, w2_ref, bn_ref, o_ref):
    """ResBlock forward on lane-dense (N*C, H*W) slabs.

    x_ref : (N*C, H*W) f32, VMEM   (row = n*C + c)
    w1_ref: (C, 9*C)   f32, VMEM   (col = (kh*3 + kw)*C + cin)
    w2_ref: (C, 9*C)   f32, VMEM
    bn_ref: (4, C)     f32, SMEM   rows = [gamma1, beta1, gamma2, beta2]
    o_ref : (N*C, H*W) f32, VMEM
    """
    NC, P = x_ref.shape
    Cout = w1_ref.shape[0]
    Cin = w1_ref.shape[1] // 9
    N = NC // Cin

    # ---- boundary-validity masks for the 8 shifted taps (shared by both convs)
    p_idx = lax.broadcasted_iota(jnp.int32, (1, P), 1)          # flat pixel index
    if W & (W - 1) == 0:                                        # power-of-two fast path
        w_idx = jnp.bitwise_and(p_idx, W - 1)                   # w = p % W
    else:
        w_idx = p_idx % W
    ok = {
        (-1, 0): p_idx >= W,            # h-1 >= 0
        (1, 0): p_idx < (H - 1) * W,    # h+1 <= H-1
        (0, -1): w_idx >= 1,            # w-1 >= 0
        (0, 1): w_idx < W - 1,          # w+1 <= W-1
    }

    def conv3x3(v, w2d):
        """3x3, stride 1, zero-pad 1: (Cin_, P) x (Co, 9*Cin_) -> (Co, P)."""
        taps = []
        for dh in (-1, 0, 1):
            for dw in (-1, 0, 1):
                s = dh * W + dw
                t = v if s == 0 else jnp.roll(v, -s, axis=1)    # lane rotate
                conds = []
                if dh != 0:
                    conds.append(ok[(dh, 0)])
                if dw != 0:
                    conds.append(ok[(0, dw)])
                if conds:
                    m = conds[0]
                    for cond in conds[1:]:
                        m = jnp.logical_and(m, cond)
                    t = jnp.where(m, t, 0.0)                    # zero halo
                taps.append(t)
        patches = jnp.concatenate(taps, axis=0)                 # (9*Cin_, P)
        # single im2col contraction on the MXU
        return jnp.dot(w2d, patches, preferred_element_type=jnp.float32)

    def bn_row_vec(row):
        """(Cout, 1) column vector assembled from SMEM scalars bn_ref[row, :]."""
        ridx = lax.broadcasted_iota(jnp.int32, (Cout, 1), 0)
        v = jnp.zeros((Cout, 1), jnp.float32)
        for c in range(Cout):
            v = jnp.where(ridx == c, bn_ref[row, c], v)
        return v

    def bn_scale_shift(ys, g_row, b_row):
        """One-pass training-mode BN stats over (N, H, W) -> per-channel scale/shift."""
        count = float(N * P)
        s1 = sum(jnp.sum(y, axis=1, keepdims=True) for y in ys)        # (Cout, 1)
        s2 = sum(jnp.sum(y * y, axis=1, keepdims=True) for y in ys)    # (Cout, 1)
        mean = s1 / count
        var = jnp.maximum(s2 / count - mean * mean, 0.0)               # biased var
        inv = lax.rsqrt(var + EPS)
        scale = bn_row_vec(g_row) * inv
        shift = bn_row_vec(b_row) - mean * scale
        return scale, shift

    w1 = w1_ref[...]
    w2 = w2_ref[...]
    xs = [x_ref[n * Cin:(n + 1) * Cin, :] for n in range(N)]   # per-image (C, P)

    # conv1 -> bn1 -> relu
    y1 = [conv3x3(x, w1) for x in xs]
    sc1, sh1 = bn_scale_shift(y1, 0, 1)
    z1 = [jnp.maximum(y * sc1 + sh1, 0.0) for y in y1]

    # conv2 -> bn2
    y2 = [conv3x3(z, w2) for z in z1]
    sc2, sh2 = bn_scale_shift(y2, 2, 3)

    # residual add (downsample=None, stride=1) + final relu; one dense store
    outs = [jnp.maximum(y * sc2 + sh2 + x, 0.0) for y, x in zip(y2, xs)]
    o_ref[...] = jnp.concatenate(outs, axis=0).astype(o_ref.dtype)


def resblock_forward(x_nchw, params):
    """ResBlock forward: x_nchw is (N, C, H, W) float32, returns same shape."""
    w1, g1, b1 = params['w1'], params['g1'], params['b1']
    w2, g2, b2 = params['w2'], params['g2'], params['b2']
    N, C, H, W = x_nchw.shape
    Cout = w1.shape[-1]
    assert Cout == C, "identity path requires inplanes == planes (downsample=None)"
    P = H * W

    # Free reshape: NCHW -> (N*C, H*W).  Lane dim = H*W (multiple of 128 -> dense).
    x2d = x_nchw.reshape(N * C, P)

    # HWIO (3,3,Cin,Cout) -> (Cout, 9*Cin), flat column = (kh*3 + kw)*Cin + cin.
    w1_2d = jnp.transpose(w1, (3, 0, 1, 2)).reshape(Cout, 9 * C)
    w2_2d = jnp.transpose(w2, (3, 0, 1, 2)).reshape(Cout, 9 * Cout)
    bn = jnp.stack([g1, b1, g2, b2], axis=0).astype(jnp.float32)       # (4, Cout)

    out2d = pl.pallas_call(
        functools.partial(_resblock_kernel, H, W),
        out_shape=jax.ShapeDtypeStruct((N * Cout, P), x_nchw.dtype),
        in_specs=[
            pl.BlockSpec(memory_space=pltpu.VMEM),   # x slab (lane-dense)
            pl.BlockSpec(memory_space=pltpu.VMEM),   # conv1 weight (Cout, 9*C)
            pl.BlockSpec(memory_space=pltpu.VMEM),   # conv2 weight
            pl.BlockSpec(memory_space=pltpu.SMEM),   # BN gammas/betas (scalars)
        ],
        out_specs=pl.BlockSpec(memory_space=pltpu.VMEM),
        compiler_params=pltpu.CompilerParams(vmem_limit_bytes=32 * 1024 * 1024),
    )(x2d, w1_2d, w2_2d, bn)

    return out2d.reshape(N, Cout, H, W)   # free reshape back to NCHW


def resblock_ref(x_nchw, params):
    """Pure-JAX reference (same semantics) used for the correctness check."""
    w1, g1, b1 = params['w1'], params['g1'], params['b1']
    w2, g2, b2 = params['w2'], params['g2'], params['b2']
    x = jnp.transpose(x_nchw, (0, 2, 3, 1))

    def conv(v, w):
        return lax.conv_general_dilated(
            v, w, window_strides=(1, 1), padding='SAME',
            dimension_numbers=('NHWC', 'HWIO', 'NHWC'))

    def bn(v, g, b):
        mean = jnp.mean(v, axis=(0, 1, 2), keepdims=True)
        var = jnp.mean((v - mean) ** 2, axis=(0, 1, 2), keepdims=True)
        return (v - mean) * lax.rsqrt(var + EPS) * g + b

    out = jax.nn.relu(bn(conv(x, w1), g1, b1))
    out = bn(conv(out, w2), g2, b2) + x
    out = jax.nn.relu(out)
    return jnp.transpose(out, (0, 3, 1, 2))


def make_params(key, inplanes, planes):
    k1, k2, k3, k4, k5, k6 = jax.random.split(key, 6)
    return {
        'w1': 0.1 * jax.random.normal(k1, (3, 3, inplanes, planes), jnp.float32),
        'g1': 1.0 + 0.1 * jax.random.normal(k2, (planes,), jnp.float32),
        'b1': 0.1 * jax.random.normal(k3, (planes,), jnp.float32),
        'w2': 0.1 * jax.random.normal(k4, (3, 3, planes, planes), jnp.float32),
        'g2': 1.0 + 0.1 * jax.random.normal(k5, (planes,), jnp.float32),
        'b2': 0.1 * jax.random.normal(k6, (planes,), jnp.float32),
    }


if __name__ == "__main__":
    key = jax.random.PRNGKey(0)
    kx, kp = jax.random.split(key)

    N, C, H, W = 2, 4, 16, 16          # inplanes = planes = 4, stride = 1
    x = jax.random.normal(kx, (N, C, H, W), jnp.float32)
    params = make_params(kp, C, C)

    out = jax.block_until_ready(resblock_forward(x, params))
    ref = jax.block_until_ready(resblock_ref(x, params))

    assert out.shape == (N, C, H, W)
    assert jnp.allclose(out, ref, atol=2e-4, rtol=2e-4), "mismatch vs JAX reference"

    print("KERNEL_OK")
</pallas_src>

<mosaic_0001>
module attributes {stable_mosaic.version = 11 : i64} {
  func.func @_resblock_kernel(%arg0: memref<8x256xf32, #tpu.memory_space<vmem>>, %arg1: memref<4x36xf32, #tpu.memory_space<vmem>>, %arg2: memref<4x36xf32, #tpu.memory_space<vmem>>, %arg3: memref<4x4xf32, #tpu.memory_space<smem>>, %arg4: memref<8x256xf32, #tpu.memory_space<vmem>>) attributes {dimension_semantics = [], scalar_prefetch = 0 : i64, scratch_operands = 0 : i64, tpu.core_type = #tpu.core_type<tc>} {
    %0 = tpu.iota {dimensions = array<i32: 1>} : vector<1x256xi32>
    %c15_i32 = arith.constant 15 : i32
    %1 = vector.broadcast %c15_i32 : i32 to vector<1x256xi32>
    %2 = arith.andi %0, %1 : vector<1x256xi32>
    %c16_i32 = arith.constant 16 : i32
    %3 = vector.broadcast %c16_i32 : i32 to vector<1x256xi32>
    %4 = arith.cmpi sge, %0, %3 : vector<1x256xi32>
    %c240_i32 = arith.constant 240 : i32
    %5 = vector.broadcast %c240_i32 : i32 to vector<1x256xi32>
    %6 = arith.cmpi slt, %0, %5 : vector<1x256xi32>
    %c1_i32 = arith.constant 1 : i32
    %7 = vector.broadcast %c1_i32 : i32 to vector<1x256xi32>
    %8 = arith.cmpi sge, %2, %7 : vector<1x256xi32>
    %c15_i32_0 = arith.constant 15 : i32
    %9 = vector.broadcast %c15_i32_0 : i32 to vector<1x256xi32>
    %10 = arith.cmpi slt, %2, %9 : vector<1x256xi32>
    %c0 = arith.constant 0 : index
    %c0_1 = arith.constant 0 : index
    %11 = vector.load %arg1[%c0, %c0_1] : memref<4x36xf32, #tpu.memory_space<vmem>>, vector<4x36xf32>
    %c0_2 = arith.constant 0 : index
    %c0_3 = arith.constant 0 : index
    %12 = vector.load %arg2[%c0_2, %c0_3] : memref<4x36xf32, #tpu.memory_space<vmem>>, vector<4x36xf32>
    %c0_4 = arith.constant 0 : index
    %c0_5 = arith.constant 0 : index
    %13 = vector.load %arg0[%c0_4, %c0_5] : memref<8x256xf32, #tpu.memory_space<vmem>>, vector<4x256xf32>
    %c4 = arith.constant 4 : index
    %c0_6 = arith.constant 0 : index
    %14 = vector.load %arg0[%c4, %c0_6] : memref<8x256xf32, #tpu.memory_space<vmem>>, vector<4x256xf32>
    %15 = vector.extract_strided_slice %13 {offsets = [0, 239], sizes = [4, 17], strides = [1, 1]} : vector<4x256xf32> to vector<4x17xf32>
    %16 = vector.extract_strided_slice %13 {offsets = [0, 0], sizes = [4, 239], strides = [1, 1]} : vector<4x256xf32> to vector<4x239xf32>
    %17 = tpu.concatenate %15, %16 in 1 : vector<4x17xf32>, vector<4x239xf32> -> vector<4x256xf32>
    %18 = arith.andi %4, %8 : vector<1x256xi1>
    %cst = arith.constant 0.000000e+00 : f32
    %19 = vector.shape_cast %18 : vector<1x256xi1> to vector<1x256xi1>
    %20 = vector.broadcast %19 : vector<1x256xi1> to vector<4x256xi1>
    %21 = vector.broadcast %cst : f32 to vector<4x256xf32>
    %22 = arith.select %20, %17, %21 : vector<4x256xi1>, vector<4x256xf32>
    %23 = vector.extract_strided_slice %13 {offsets = [0, 240], sizes = [4, 16], strides = [1, 1]} : vector<4x256xf32> to vector<4x16xf32>
    %24 = vector.extract_strided_slice %13 {offsets = [0, 0], sizes = [4, 240], strides = [1, 1]} : vector<4x256xf32> to vector<4x240xf32>
    %25 = tpu.concatenate %23, %24 in 1 : vector<4x16xf32>, vector<4x240xf32> -> vector<4x256xf32>
    %cst_7 = arith.constant 0.000000e+00 : f32
    %26 = vector.shape_cast %4 : vector<1x256xi1> to vector<1x256xi1>
    %27 = vector.broadcast %26 : vector<1x256xi1> to vector<4x256xi1>
    %28 = vector.broadcast %cst_7 : f32 to vector<4x256xf32>
    %29 = arith.select %27, %25, %28 : vector<4x256xi1>, vector<4x256xf32>
    %30 = vector.extract_strided_slice %13 {offsets = [0, 241], sizes = [4, 15], strides = [1, 1]} : vector<4x256xf32> to vector<4x15xf32>
    %31 = vector.extract_strided_slice %13 {offsets = [0, 0], sizes = [4, 241], strides = [1, 1]} : vector<4x256xf32> to vector<4x241xf32>
    %32 = tpu.concatenate %30, %31 in 1 : vector<4x15xf32>, vector<4x241xf32> -> vector<4x256xf32>
    %33 = arith.andi %4, %10 : vector<1x256xi1>
    %cst_8 = arith.constant 0.000000e+00 : f32
    %34 = vector.shape_cast %33 : vector<1x256xi1> to vector<1x256xi1>
    %35 = vector.broadcast %34 : vector<1x256xi1> to vector<4x256xi1>
    %36 = vector.broadcast %cst_8 : f32 to vector<4x256xf32>
    %37 = arith.select %35, %32, %36 : vector<4x256xi1>, vector<4x256xf32>
    %38 = vector.extract_strided_slice %13 {offsets = [0, 255], sizes = [4, 1], strides = [1, 1]} : vector<4x256xf32> to vector<4x1xf32>
    %39 = vector.extract_strided_slice %13 {offsets = [0, 0], sizes = [4, 255], strides = [1, 1]} : vector<4x256xf32> to vector<4x255xf32>
    %40 = tpu.concatenate %38, %39 in 1 : vector<4x1xf32>, vector<4x255xf32> -> vector<4x256xf32>
    %cst_9 = arith.constant 0.000000e+00 : f32
    %41 = vector.shape_cast %8 : vector<1x256xi1> to vector<1x256xi1>
    %42 = vector.broadcast %41 : vector<1x256xi1> to vector<4x256xi1>
    %43 = vector.broadcast %cst_9 : f32 to vector<4x256xf32>
    %44 = arith.select %42, %40, %43 : vector<4x256xi1>, vector<4x256xf32>
    %45 = vector.extract_strided_slice %13 {offsets = [0, 1], sizes = [4, 255], strides = [1, 1]} : vector<4x256xf32> to vector<4x255xf32>
    %46 = vector.extract_strided_slice %13 {offsets = [0, 0], sizes = [4, 1], strides = [1, 1]} : vector<4x256xf32> to vector<4x1xf32>
    %47 = tpu.concatenate %45, %46 in 1 : vector<4x255xf32>, vector<4x1xf32> -> vector<4x256xf32>
    %cst_10 = arith.constant 0.000000e+00 : f32
    %48 = vector.shape_cast %10 : vector<1x256xi1> to vector<1x256xi1>
    %49 = vector.broadcast %48 : vector<1x256xi1> to vector<4x256xi1>
    %50 = vector.broadcast %cst_10 : f32 to vector<4x256xf32>
    %51 = arith.select %49, %47, %50 : vector<4x256xi1>, vector<4x256xf32>
    %52 = vector.extract_strided_slice %13 {offsets = [0, 15], sizes = [4, 241], strides = [1, 1]} : vector<4x256xf32> to vector<4x241xf32>
    %53 = vector.extract_strided_slice %13 {offsets = [0, 0], sizes = [4, 15], strides = [1, 1]} : vector<4x256xf32> to vector<4x15xf32>
    %54 = tpu.concatenate %52, %53 in 1 : vector<4x241xf32>, vector<4x15xf32> -> vector<4x256xf32>
    %55 = arith.andi %6, %8 : vector<1x256xi1>
    %cst_11 = arith.constant 0.000000e+00 : f32
    %56 = vector.shape_cast %55 : vector<1x256xi1> to vector<1x256xi1>
    %57 = vector.broadcast %56 : vector<1x256xi1> to vector<4x256xi1>
    %58 = vector.broadcast %cst_11 : f32 to vector<4x256xf32>
    %59 = arith.select %57, %54, %58 : vector<4x256xi1>, vector<4x256xf32>
    %60 = vector.extract_strided_slice %13 {offsets = [0, 16], sizes = [4, 240], strides = [1, 1]} : vector<4x256xf32> to vector<4x240xf32>
    %61 = vector.extract_strided_slice %13 {offsets = [0, 0], sizes = [4, 16], strides = [1, 1]} : vector<4x256xf32> to vector<4x16xf32>
    %62 = tpu.concatenate %60, %61 in 1 : vector<4x240xf32>, vector<4x16xf32> -> vector<4x256xf32>
    %cst_12 = arith.constant 0.000000e+00 : f32
    %63 = vector.shape_cast %6 : vector<1x256xi1> to vector<1x256xi1>
    %64 = vector.broadcast %63 : vector<1x256xi1> to vector<4x256xi1>
    %65 = vector.broadcast %cst_12 : f32 to vector<4x256xf32>
    %66 = arith.select %64, %62, %65 : vector<4x256xi1>, vector<4x256xf32>
    %67 = vector.extract_strided_slice %13 {offsets = [0, 17], sizes = [4, 239], strides = [1, 1]} : vector<4x256xf32> to vector<4x239xf32>
    %68 = vector.extract_strided_slice %13 {offsets = [0, 0], sizes = [4, 17], strides = [1, 1]} : vector<4x256xf32> to vector<4x17xf32>
    %69 = tpu.concatenate %67, %68 in 1 : vector<4x239xf32>, vector<4x17xf32> -> vector<4x256xf32>
    %70 = arith.andi %6, %10 : vector<1x256xi1>
    %cst_13 = arith.constant 0.000000e+00 : f32
    %71 = vector.shape_cast %70 : vector<1x256xi1> to vector<1x256xi1>
    %72 = vector.broadcast %71 : vector<1x256xi1> to vector<4x256xi1>
    %73 = vector.broadcast %cst_13 : f32 to vector<4x256xf32>
    %74 = arith.select %72, %69, %73 : vector<4x256xi1>, vector<4x256xf32>
    %75 = tpu.concatenate %22, %29, %37, %44, %13, %51, %59, %66, %74 in 0 : vector<4x256xf32>, vector<4x256xf32>, vector<4x256xf32>, vector<4x256xf32>, vector<4x256xf32>, vector<4x256xf32>, vector<4x256xf32>, vector<4x256xf32>, vector<4x256xf32> -> vector<36x256xf32>
    %cst_14 = arith.constant dense<0.000000e+00> : vector<4x256xf32>
    %76 = tpu.matmul %11, %75, %cst_14 {dimension_numbers = #tpu.dot_dimension_numbers<[1], [0], [0], [1], [0, 0, 1, 1], [], []>} : vector<4x36xf32>, vector<36x256xf32>, vector<4x256xf32> -> vector<4x256xf32>
    %77 = vector.extract_strided_slice %14 {offsets = [0, 239], sizes = [4, 17], strides = [1, 1]} : vector<4x256xf32> to vector<4x17xf32>
    %78 = vector.extract_strided_slice %14 {offsets = [0, 0], sizes = [4, 239], strides = [1, 1]} : vector<4x256xf32> to vector<4x239xf32>
    %79 = tpu.concatenate %77, %78 in 1 : vector<4x17xf32>, vector<4x239xf32> -> vector<4x256xf32>
    %80 = arith.andi %4, %8 : vector<1x256xi1>
    %cst_15 = arith.constant 0.000000e+00 : f32
    %81 = vector.shape_cast %80 : vector<1x256xi1> to vector<1x256xi1>
    %82 = vector.broadcast %81 : vector<1x256xi1> to vector<4x256xi1>
    %83 = vector.broadcast %cst_15 : f32 to vector<4x256xf32>
    %84 = arith.select %82, %79, %83 : vector<4x256xi1>, vector<4x256xf32>
    %85 = vector.extract_strided_slice %14 {offsets = [0, 240], sizes = [4, 16], strides = [1, 1]} : vector<4x256xf32> to vector<4x16xf32>
    %86 = vector.extract_strided_slice %14 {offsets = [0, 0], sizes = [4, 240], strides = [1, 1]} : vector<4x256xf32> to vector<4x240xf32>
    %87 = tpu.concatenate %85, %86 in 1 : vector<4x16xf32>, vector<4x240xf32> -> vector<4x256xf32>
    %cst_16 = arith.constant 0.000000e+00 : f32
    %88 = vector.shape_cast %4 : vector<1x256xi1> to vector<1x256xi1>
    %89 = vector.broadcast %88 : vector<1x256xi1> to vector<4x256xi1>
    %90 = vector.broadcast %cst_16 : f32 to vector<4x256xf32>
    %91 = arith.select %89, %87, %90 : vector<4x256xi1>, vector<4x256xf32>
    %92 = vector.extract_strided_slice %14 {offsets = [0, 241], sizes = [4, 15], strides = [1, 1]} : vector<4x256xf32> to vector<4x15xf32>
    %93 = vector.extract_strided_slice %14 {offsets = [0, 0], sizes = [4, 241], strides = [1, 1]} : vector<4x256xf32> to vector<4x241xf32>
    %94 = tpu.concatenate %92, %93 in 1 : vector<4x15xf32>, vector<4x241xf32> -> vector<4x256xf32>
    %95 = arith.andi %4, %10 : vector<1x256xi1>
    %cst_17 = arith.constant 0.000000e+00 : f32
    %96 = vector.shape_cast %95 : vector<1x256xi1> to vector<1x256xi1>
    %97 = vector.broadcast %96 : vector<1x256xi1> to vector<4x256xi1>
    %98 = vector.broadcast %cst_17 : f32 to vector<4x256xf32>
    %99 = arith.select %97, %94, %98 : vector<4x256xi1>, vector<4x256xf32>
    %100 = vector.extract_strided_slice %14 {offsets = [0, 255], sizes = [4, 1], strides = [1, 1]} : vector<4x256xf32> to vector<4x1xf32>
    %101 = vector.extract_strided_slice %14 {offsets = [0, 0], sizes = [4, 255], strides = [1, 1]} : vector<4x256xf32> to vector<4x255xf32>
    %102 = tpu.concatenate %100, %101 in 1 : vector<4x1xf32>, vector<4x255xf32> -> vector<4x256xf32>
    %cst_18 = arith.constant 0.000000e+00 : f32
    %103 = vector.shape_cast %8 : vector<1x256xi1> to vector<1x256xi1>
    %104 = vector.broadcast %103 : vector<1x256xi1> to vector<4x256xi1>
    %105 = vector.broadcast %cst_18 : f32 to vector<4x256xf32>
    %106 = arith.select %104, %102, %105 : vector<4x256xi1>, vector<4x256xf32>
    %107 = vector.extract_strided_slice %14 {offsets = [0, 1], sizes = [4, 255], strides = [1, 1]} : vector<4x256xf32> to vector<4x255xf32>
    %108 = vector.extract_strided_slice %14 {offsets = [0, 0], sizes = [4, 1], strides = [1, 1]} : vector<4x256xf32> to vector<4x1xf32>
    %109 = tpu.concatenate %107, %108 in 1 : vector<4x255xf32>, vector<4x1xf32> -> vector<4x256xf32>
    %cst_19 = arith.constant 0.000000e+00 : f32
    %110 = vector.shape_cast %10 : vector<1x256xi1> to vector<1x256xi1>
    %111 = vector.broadcast %110 : vector<1x256xi1> to vector<4x256xi1>
    %112 = vector.broadcast %cst_19 : f32 to vector<4x256xf32>
    %113 = arith.select %111, %109, %112 : vector<4x256xi1>, vector<4x256xf32>
    %114 = vector.extract_strided_slice %14 {offsets = [0, 15], sizes = [4, 241], strides = [1, 1]} : vector<4x256xf32> to vector<4x241xf32>
    %115 = vector.extract_strided_slice %14 {offsets = [0, 0], sizes = [4, 15], strides = [1, 1]} : vector<4x256xf32> to vector<4x15xf32>
    %116 = tpu.concatenate %114, %115 in 1 : vector<4x241xf32>, vector<4x15xf32> -> vector<4x256xf32>
    %117 = arith.andi %6, %8 : vector<1x256xi1>
    %cst_20 = arith.constant 0.000000e+00 : f32
    %118 = vector.shape_cast %117 : vector<1x256xi1> to vector<1x256xi1>
    %119 = vector.broadcast %118 : vector<1x256xi1> to vector<4x256xi1>
    %120 = vector.broadcast %cst_20 : f32 to vector<4x256xf32>
    %121 = arith.select %119, %116, %120 : vector<4x256xi1>, vector<4x256xf32>
    %122 = vector.extract_strided_slice %14 {offsets = [0, 16], sizes = [4, 240], strides = [1, 1]} : vector<4x256xf32> to vector<4x240xf32>
    %123 = vector.extract_strided_slice %14 {offsets = [0, 0], sizes = [4, 16], strides = [1, 1]} : vector<4x256xf32> to vector<4x16xf32>
    %124 = tpu.concatenate %122, %123 in 1 : vector<4x240xf32>, vector<4x16xf32> -> vector<4x256xf32>
    %cst_21 = arith.constant 0.000000e+00 : f32
    %125 = vector.shape_cast %6 : vector<1x256xi1> to vector<1x256xi1>
    %126 = vector.broadcast %125 : vector<1x256xi1> to vector<4x256xi1>
    %127 = vector.broadcast %cst_21 : f32 to vector<4x256xf32>
    %128 = arith.select %126, %124, %127 : vector<4x256xi1>, vector<4x256xf32>
    %129 = vector.extract_strided_slice %14 {offsets = [0, 17], sizes = [4, 239], strides = [1, 1]} : vector<4x256xf32> to vector<4x239xf32>
    %130 = vector.extract_strided_slice %14 {offsets = [0, 0], sizes = [4, 17], strides = [1, 1]} : vector<4x256xf32> to vector<4x17xf32>
    %131 = tpu.concatenate %129, %130 in 1 : vector<4x239xf32>, vector<4x17xf32> -> vector<4x256xf32>
    %132 = arith.andi %6, %10 : vector<1x256xi1>
    %cst_22 = arith.constant 0.000000e+00 : f32
    %133 = vector.shape_cast %132 : vector<1x256xi1> to vector<1x256xi1>
    %134 = vector.broadcast %133 : vector<1x256xi1> to vector<4x256xi1>
    %135 = vector.broadcast %cst_22 : f32 to vector<4x256xf32>
    %136 = arith.select %134, %131, %135 : vector<4x256xi1>, vector<4x256xf32>
    %137 = tpu.concatenate %84, %91, %99, %106, %14, %113, %121, %128, %136 in 0 : vector<4x256xf32>, vector<4x256xf32>, vector<4x256xf32>, vector<4x256xf32>, vector<4x256xf32>, vector<4x256xf32>, vector<4x256xf32>, vector<4x256xf32>, vector<4x256xf32> -> vector<36x256xf32>
    %cst_23 = arith.constant dense<0.000000e+00> : vector<4x256xf32>
    %138 = tpu.matmul %11, %137, %cst_23 {dimension_numbers = #tpu.dot_dimension_numbers<[1], [0], [0], [1], [0, 0, 1, 1], [], []>} : vector<4x36xf32>, vector<36x256xf32>, vector<4x256xf32> -> vector<4x256xf32>
    %cst_24 = arith.constant dense<0.000000e+00> : vector<4xf32>
    %139 = vector.multi_reduction <add>, %76, %cst_24 [1] : vector<4x256xf32> to vector<4xf32>
    %140 = vector.shape_cast %139 : vector<4xf32> to vector<4x1xf32>
    %cst_25 = arith.constant 0.000000e+00 : f32
    %141 = vector.broadcast %cst_25 : f32 to vector<4x1xf32>
    %142 = arith.addf %141, %140 : vector<4x1xf32>
    %cst_26 = arith.constant dense<0.000000e+00> : vector<4xf32>
    %143 = vector.multi_reduction <add>, %138, %cst_26 [1] : vector<4x256xf32> to vector<4xf32>
    %144 = vector.shape_cast %143 : vector<4xf32> to vector<4x1xf32>
    %145 = arith.addf %142, %144 : vector<4x1xf32>
    %146 = arith.mulf %76, %76 : vector<4x256xf32>
    %cst_27 = arith.constant dense<0.000000e+00> : vector<4xf32>
    %147 = vector.multi_reduction <add>, %146, %cst_27 [1] : vector<4x256xf32> to vector<4xf32>
    %148 = vector.shape_cast %147 : vector<4xf32> to vector<4x1xf32>
    %cst_28 = arith.constant 0.000000e+00 : f32
    %149 = vector.broadcast %cst_28 : f32 to vector<4x1xf32>
    %150 = arith.addf %149, %148 : vector<4x1xf32>
    %151 = arith.mulf %138, %138 : vector<4x256xf32>
    %cst_29 = arith.constant dense<0.000000e+00> : vector<4xf32>
    %152 = vector.multi_reduction <add>, %151, %cst_29 [1] : vector<4x256xf32> to vector<4xf32>
    %153 = vector.shape_cast %152 : vector<4xf32> to vector<4x1xf32>
    %154 = arith.addf %150, %153 : vector<4x1xf32>
    %cst_30 = arith.constant 5.120000e+02 : f32
    %155 = vector.broadcast %cst_30 : f32 to vector<4x1xf32>
    %156 = arith.divf %145, %155 : vector<4x1xf32>
    %cst_31 = arith.constant 5.120000e+02 : f32
    %157 = vector.broadcast %cst_31 : f32 to vector<4x1xf32>
    %158 = arith.divf %154, %157 : vector<4x1xf32>
    %159 = arith.mulf %156, %156 : vector<4x1xf32>
    %160 = arith.subf %158, %159 : vector<4x1xf32>
    %cst_32 = arith.constant 0.000000e+00 : f32
    %161 = vector.broadcast %cst_32 : f32 to vector<4x1xf32>
    %162 = arith.maximumf %160, %161 : vector<4x1xf32>
    %cst_33 = arith.constant 9.99999974E-6 : f32
    %163 = vector.broadcast %cst_33 : f32 to vector<4x1xf32>
    %164 = arith.addf %162, %163 : vector<4x1xf32>
    %165 = math.rsqrt %164 : vector<4x1xf32>
    %166 = tpu.iota {dimensions = array<i32: 0>} : vector<4x1xi32>
    %cst_34 = arith.constant 0.000000e+00 : f32
    %167 = vector.broadcast %cst_34 : f32 to vector<4x1xf32>
    %c0_i32 = arith.constant 0 : i32
    %168 = vector.broadcast %c0_i32 : i32 to vector<4x1xi32>
    %169 = arith.cmpi eq, %166, %168 : vector<4x1xi32>
    %c0_35 = arith.constant 0 : index
    %c0_36 = arith.constant 0 : index
    %170 = memref.load %arg3[%c0_35, %c0_36] : memref<4x4xf32, #tpu.memory_space<smem>>
    %171 = vector.broadcast %170 : f32 to vector<4x1xf32>
    %172 = arith.select %169, %171, %167 : vector<4x1xi1>, vector<4x1xf32>
    %c1_i32_37 = arith.constant 1 : i32
    %173 = vector.broadcast %c1_i32_37 : i32 to vector<4x1xi32>
    %174 = arith.cmpi eq, %166, %173 : vector<4x1xi32>
    %c0_38 = arith.constant 0 : index
    %c1 = arith.constant 1 : index
    %175 = memref.load %arg3[%c0_38, %c1] : memref<4x4xf32, #tpu.memory_space<smem>>
    %176 = vector.broadcast %175 : f32 to vector<4x1xf32>
    %177 = arith.select %174, %176, %172 : vector<4x1xi1>, vector<4x1xf32>
    %c2_i32 = arith.constant 2 : i32
    %178 = vector.broadcast %c2_i32 : i32 to vector<4x1xi32>
    %179 = arith.cmpi eq, %166, %178 : vector<4x1xi32>
    %c0_39 = arith.constant 0 : index
    %c2 = arith.constant 2 : index
    %180 = memref.load %arg3[%c0_39, %c2] : memref<4x4xf32, #tpu.memory_space<smem>>
    %181 = vector.broadcast %180 : f32 to vector<4x1xf32>
    %182 = arith.select %179, %181, %177 : vector<4x1xi1>, vector<4x1xf32>
    %c3_i32 = arith.constant 3 : i32
    %183 = vector.broadcast %c3_i32 : i32 to vector<4x1xi32>
    %184 = arith.cmpi eq, %166, %183 : vector<4x1xi32>
    %c0_40 = arith.constant 0 : index
    %c3 = arith.constant 3 : index
    %185 = memref.load %arg3[%c0_40, %c3] : memref<4x4xf32, #tpu.memory_space<smem>>
    %186 = vector.broadcast %185 : f32 to vector<4x1xf32>
    %187 = arith.select %184, %186, %182 : vector<4x1xi1>, vector<4x1xf32>
    %188 = arith.mulf %187, %165 : vector<4x1xf32>
    %189 = tpu.iota {dimensions = array<i32: 0>} : vector<4x1xi32>
    %cst_41 = arith.constant 0.000000e+00 : f32
    %190 = vector.broadcast %cst_41 : f32 to vector<4x1xf32>
    %c0_i32_42 = arith.constant 0 : i32
    %191 = vector.broadcast %c0_i32_42 : i32 to vector<4x1xi32>
    %192 = arith.cmpi eq, %189, %191 : vector<4x1xi32>
    %c1_43 = arith.constant 1 : index
    %c0_44 = arith.constant 0 : index
    %193 = memref.load %arg3[%c1_43, %c0_44] : memref<4x4xf32, #tpu.memory_space<smem>>
    %194 = vector.broadcast %193 : f32 to vector<4x1xf32>
    %195 = arith.select %192, %194, %190 : vector<4x1xi1>, vector<4x1xf32>
    %c1_i32_45 = arith.constant 1 : i32
    %196 = vector.broadcast %c1_i32_45 : i32 to vector<4x1xi32>
    %197 = arith.cmpi eq, %189, %196 : vector<4x1xi32>
    %c1_46 = arith.constant 1 : index
    %c1_47 = arith.constant 1 : index
    %198 = memref.load %arg3[%c1_46, %c1_47] : memref<4x4xf32, #tpu.memory_space<smem>>
    %199 = vector.broadcast %198 : f32 to vector<4x1xf32>
    %200 = arith.select %197, %199, %195 : vector<4x1xi1>, vector<4x1xf32>
    %c2_i32_48 = arith.constant 2 : i32
    %201 = vector.broadcast %c2_i32_48 : i32 to vector<4x1xi32>
    %202 = arith.cmpi eq, %189, %201 : vector<4x1xi32>
    %c1_49 = arith.constant 1 : index
    %c2_50 = arith.constant 2 : index
    %203 = memref.load %arg3[%c1_49, %c2_50] : memref<4x4xf32, #tpu.memory_space<smem>>
    %204 = vector.broadcast %203 : f32 to vector<4x1xf32>
    %205 = arith.select %202, %204, %200 : vector<4x1xi1>, vector<4x1xf32>
    %c3_i32_51 = arith.constant 3 : i32
    %206 = vector.broadcast %c3_i32_51 : i32 to vector<4x1xi32>
    %207 = arith.cmpi eq, %189, %206 : vector<4x1xi32>
    %c1_52 = arith.constant 1 : index
    %c3_53 = arith.constant 3 : index
    %208 = memref.load %arg3[%c1_52, %c3_53] : memref<4x4xf32, #tpu.memory_space<smem>>
    %209 = vector.broadcast %208 : f32 to vector<4x1xf32>
    %210 = arith.select %207, %209, %205 : vector<4x1xi1>, vector<4x1xf32>
    %211 = arith.mulf %156, %188 : vector<4x1xf32>
    %212 = arith.subf %210, %211 : vector<4x1xf32>
    %213 = vector.broadcast %188 : vector<4x1xf32> to vector<4x256xf32>
    %214 = arith.mulf %76, %213 : vector<4x256xf32>
    %215 = vector.broadcast %212 : vector<4x1xf32> to vector<4x256xf32>
    %216 = arith.addf %214, %215 : vector<4x256xf32>
    %cst_54 = arith.constant 0.000000e+00 : f32
    %217 = vector.broadcast %cst_54 : f32 to vector<4x256xf32>
    %218 = arith.maximumf %216, %217 : vector<4x256xf32>
    %219 = vector.broadcast %188 : vector<4x1xf32> to vector<4x256xf32>
    %220 = arith.mulf %138, %219 : vector<4x256xf32>
    %221 = vector.broadcast %212 : vector<4x1xf32> to vector<4x256xf32>
    %222 = arith.addf %220, %221 : vector<4x256xf32>
    %cst_55 = arith.constant 0.000000e+00 : f32
    %223 = vector.broadcast %cst_55 : f32 to vector<4x256xf32>
    %224 = arith.maximumf %222, %223 : vector<4x256xf32>
    %225 = vector.extract_strided_slice %218 {offsets = [0, 239], sizes = [4, 17], strides = [1, 1]} : vector<4x256xf32> to vector<4x17xf32>
    %226 = vector.extract_strided_slice %218 {offsets = [0, 0], sizes = [4, 239], strides = [1, 1]} : vector<4x256xf32> to vector<4x239xf32>
    %227 = tpu.concatenate %225, %226 in 1 : vector<4x17xf32>, vector<4x239xf32> -> vector<4x256xf32>
    %228 = arith.andi %4, %8 : vector<1x256xi1>
    %cst_56 = arith.constant 0.000000e+00 : f32
    %229 = vector.shape_cast %228 : vector<1x256xi1> to vector<1x256xi1>
    %230 = vector.broadcast %229 : vector<1x256xi1> to vector<4x256xi1>
    %231 = vector.broadcast %cst_56 : f32 to vector<4x256xf32>
    %232 = arith.select %230, %227, %231 : vector<4x256xi1>, vector<4x256xf32>
    %233 = vector.extract_strided_slice %218 {offsets = [0, 240], sizes = [4, 16], strides = [1, 1]} : vector<4x256xf32> to vector<4x16xf32>
    %234 = vector.extract_strided_slice %218 {offsets = [0, 0], sizes = [4, 240], strides = [1, 1]} : vector<4x256xf32> to vector<4x240xf32>
    %235 = tpu.concatenate %233, %234 in 1 : vector<4x16xf32>, vector<4x240xf32> -> vector<4x256xf32>
    %cst_57 = arith.constant 0.000000e+00 : f32
    %236 = vector.shape_cast %4 : vector<1x256xi1> to vector<1x256xi1>
    %237 = vector.broadcast %236 : vector<1x256xi1> to vector<4x256xi1>
    %238 = vector.broadcast %cst_57 : f32 to vector<4x256xf32>
    %239 = arith.select %237, %235, %238 : vector<4x256xi1>, vector<4x256xf32>
    %240 = vector.extract_strided_slice %218 {offsets = [0, 241], sizes = [4, 15], strides = [1, 1]} : vector<4x256xf32> to vector<4x15xf32>
    %241 = vector.extract_strided_slice %218 {offsets = [0, 0], sizes = [4, 241], strides = [1, 1]} : vector<4x256xf32> to vector<4x241xf32>
    %242 = tpu.concatenate %240, %241 in 1 : vector<4x15xf32>, vector<4x241xf32> -> vector<4x256xf32>
    %243 = arith.andi %4, %10 : vector<1x256xi1>
    %cst_58 = arith.constant 0.000000e+00 : f32
    %244 = vector.shape_cast %243 : vector<1x256xi1> to vector<1x256xi1>
    %245 = vector.broadcast %244 : vector<1x256xi1> to vector<4x256xi1>
    %246 = vector.broadcast %cst_58 : f32 to vector<4x256xf32>
    %247 = arith.select %245, %242, %246 : vector<4x256xi1>, vector<4x256xf32>
    %248 = vector.extract_strided_slice %218 {offsets = [0, 255], sizes = [4, 1], strides = [1, 1]} : vector<4x256xf32> to vector<4x1xf32>
    %249 = vector.extract_strided_slice %218 {offsets = [0, 0], sizes = [4, 255], strides = [1, 1]} : vector<4x256xf32> to vector<4x255xf32>
    %250 = tpu.concatenate %248, %249 in 1 : vector<4x1xf32>, vector<4x255xf32> -> vector<4x256xf32>
    %cst_59 = arith.constant 0.000000e+00 : f32
    %251 = vector.shape_cast %8 : vector<1x256xi1> to vector<1x256xi1>
    %252 = vector.broadcast %251 : vector<1x256xi1> to vector<4x256xi1>
    %253 = vector.broadcast %cst_59 : f32 to vector<4x256xf32>
    %254 = arith.select %252, %250, %253 : vector<4x256xi1>, vector<4x256xf32>
    %255 = vector.extract_strided_slice %218 {offsets = [0, 1], sizes = [4, 255], strides = [1, 1]} : vector<4x256xf32> to vector<4x255xf32>
    %256 = vector.extract_strided_slice %218 {offsets = [0, 0], sizes = [4, 1], strides = [1, 1]} : vector<4x256xf32> to vector<4x1xf32>
    %257 = tpu.concatenate %255, %256 in 1 : vector<4x255xf32>, vector<4x1xf32> -> vector<4x256xf32>
    %cst_60 = arith.constant 0.000000e+00 : f32
    %258 = vector.shape_cast %10 : vector<1x256xi1> to vector<1x256xi1>
    %259 = vector.broadcast %258 : vector<1x256xi1> to vector<4x256xi1>
    %260 = vector.broadcast %cst_60 : f32 to vector<4x256xf32>
    %261 = arith.select %259, %257, %260 : vector<4x256xi1>, vector<4x256xf32>
    %262 = vector.extract_strided_slice %218 {offsets = [0, 15], sizes = [4, 241], strides = [1, 1]} : vector<4x256xf32> to vector<4x241xf32>
    %263 = vector.extract_strided_slice %218 {offsets = [0, 0], sizes = [4, 15], strides = [1, 1]} : vector<4x256xf32> to vector<4x15xf32>
    %264 = tpu.concatenate %262, %263 in 1 : vector<4x241xf32>, vector<4x15xf32> -> vector<4x256xf32>
    %265 = arith.andi %6, %8 : vector<1x256xi1>
    %cst_61 = arith.constant 0.000000e+00 : f32
    %266 = vector.shape_cast %265 : vector<1x256xi1> to vector<1x256xi1>
    %267 = vector.broadcast %266 : vector<1x256xi1> to vector<4x256xi1>
    %268 = vector.broadcast %cst_61 : f32 to vector<4x256xf32>
    %269 = arith.select %267, %264, %268 : vector<4x256xi1>, vector<4x256xf32>
    %270 = vector.extract_strided_slice %218 {offsets = [0, 16], sizes = [4, 240], strides = [1, 1]} : vector<4x256xf32> to vector<4x240xf32>
    %271 = vector.extract_strided_slice %218 {offsets = [0, 0], sizes = [4, 16], strides = [1, 1]} : vector<4x256xf32> to vector<4x16xf32>
    %272 = tpu.concatenate %270, %271 in 1 : vector<4x240xf32>, vector<4x16xf32> -> vector<4x256xf32>
    %cst_62 = arith.constant 0.000000e+00 : f32
    %273 = vector.shape_cast %6 : vector<1x256xi1> to vector<1x256xi1>
    %274 = vector.broadcast %273 : vector<1x256xi1> to vector<4x256xi1>
    %275 = vector.broadcast %cst_62 : f32 to vector<4x256xf32>
    %276 = arith.select %274, %272, %275 : vector<4x256xi1>, vector<4x256xf32>
    %277 = vector.extract_strided_slice %218 {offsets = [0, 17], sizes = [4, 239], strides = [1, 1]} : vector<4x256xf32> to vector<4x239xf32>
    %278 = vector.extract_strided_slice %218 {offsets = [0, 0], sizes = [4, 17], strides = [1, 1]} : vector<4x256xf32> to vector<4x17xf32>
    %279 = tpu.concatenate %277, %278 in 1 : vector<4x239xf32>, vector<4x17xf32> -> vector<4x256xf32>
    %280 = arith.andi %6, %10 : vector<1x256xi1>
    %cst_63 = arith.constant 0.000000e+00 : f32
    %281 = vector.shape_cast %280 : vector<1x256xi1> to vector<1x256xi1>
    %282 = vector.broadcast %281 : vector<1x256xi1> to vector<4x256xi1>
    %283 = vector.broadcast %cst_63 : f32 to vector<4x256xf32>
    %284 = arith.select %282, %279, %283 : vector<4x256xi1>, vector<4x256xf32>
    %285 = tpu.concatenate %232, %239, %247, %254, %218, %261, %269, %276, %284 in 0 : vector<4x256xf32>, vector<4x256xf32>, vector<4x256xf32>, vector<4x256xf32>, vector<4x256xf32>, vector<4x256xf32>, vector<4x256xf32>, vector<4x256xf32>, vector<4x256xf32> -> vector<36x256xf32>
    %cst_64 = arith.constant dense<0.000000e+00> : vector<4x256xf32>
    %286 = tpu.matmul %12, %285, %cst_64 {dimension_numbers = #tpu.dot_dimension_numbers<[1], [0], [0], [1], [0, 0, 1, 1], [], []>} : vector<4x36xf32>, vector<36x256xf32>, vector<4x256xf32> -> vector<4x256xf32>
    %287 = vector.extract_strided_slice %224 {offsets = [0, 239], sizes = [4, 17], strides = [1, 1]} : vector<4x256xf32> to vector<4x17xf32>
    %288 = vector.extract_strided_slice %224 {offsets = [0, 0], sizes = [4, 239], strides = [1, 1]} : vector<4x256xf32> to vector<4x239xf32>
    %289 = tpu.concatenate %287, %288 in 1 : vector<4x17xf32>, vector<4x239xf32> -> vector<4x256xf32>
    %290 = arith.andi %4, %8 : vector<1x256xi1>
    %cst_65 = arith.constant 0.000000e+00 : f32
    %291 = vector.shape_cast %290 : vector<1x256xi1> to vector<1x256xi1>
    %292 = vector.broadcast %291 : vector<1x256xi1> to vector<4x256xi1>
    %293 = vector.broadcast %cst_65 : f32 to vector<4x256xf32>
    %294 = arith.select %292, %289, %293 : vector<4x256xi1>, vector<4x256xf32>
    %295 = vector.extract_strided_slice %224 {offsets = [0, 240], sizes = [4, 16], strides = [1, 1]} : vector<4x256xf32> to vector<4x16xf32>
    %296 = vector.extract_strided_slice %224 {offsets = [0, 0], sizes = [4, 240], strides = [1, 1]} : vector<4x256xf32> to vector<4x240xf32>
    %297 = tpu.concatenate %295, %296 in 1 : vector<4x16xf32>, vector<4x240xf32> -> vector<4x256xf32>
    %cst_66 = arith.constant 0.000000e+00 : f32
    %298 = vector.shape_cast %4 : vector<1x256xi1> to vector<1x256xi1>
    %299 = vector.broadcast %298 : vector<1x256xi1> to vector<4x256xi1>
    %300 = vector.broadcast %cst_66 : f32 to vector<4x256xf32>
    %301 = arith.select %299, %297, %300 : vector<4x256xi1>, vector<4x256xf32>
    %302 = vector.extract_strided_slice %224 {offsets = [0, 241], sizes = [4, 15], strides = [1, 1]} : vector<4x256xf32> to vector<4x15xf32>
    %303 = vector.extract_strided_slice %224 {offsets = [0, 0], sizes = [4, 241], strides = [1, 1]} : vector<4x256xf32> to vector<4x241xf32>
    %304 = tpu.concatenate %302, %303 in 1 : vector<4x15xf32>, vector<4x241xf32> -> vector<4x256xf32>
    %305 = arith.andi %4, %10 : vector<1x256xi1>
    %cst_67 = arith.constant 0.000000e+00 : f32
    %306 = vector.shape_cast %305 : vector<1x256xi1> to vector<1x256xi1>
    %307 = vector.broadcast %306 : vector<1x256xi1> to vector<4x256xi1>
    %308 = vector.broadcast %cst_67 : f32 to vector<4x256xf32>
    %309 = arith.select %307, %304, %308 : vector<4x256xi1>, vector<4x256xf32>
    %310 = vector.extract_strided_slice %224 {offsets = [0, 255], sizes = [4, 1], strides = [1, 1]} : vector<4x256xf32> to vector<4x1xf32>
    %311 = vector.extract_strided_slice %224 {offsets = [0, 0], sizes = [4, 255], strides = [1, 1]} : vector<4x256xf32> to vector<4x255xf32>
    %312 = tpu.concatenate %310, %311 in 1 : vector<4x1xf32>, vector<4x255xf32> -> vector<4x256xf32>
    %cst_68 = arith.constant 0.000000e+00 : f32
    %313 = vector.shape_cast %8 : vector<1x256xi1> to vector<1x256xi1>
    %314 = vector.broadcast %313 : vector<1x256xi1> to vector<4x256xi1>
    %315 = vector.broadcast %cst_68 : f32 to vector<4x256xf32>
    %316 = arith.select %314, %312, %315 : vector<4x256xi1>, vector<4x256xf32>
    %317 = vector.extract_strided_slice %224 {offsets = [0, 1], sizes = [4, 255], strides = [1, 1]} : vector<4x256xf32> to vector<4x255xf32>
    %318 = vector.extract_strided_slice %224 {offsets = [0, 0], sizes = [4, 1], strides = [1, 1]} : vector<4x256xf32> to vector<4x1xf32>
    %319 = tpu.concatenate %317, %318 in 1 : vector<4x255xf32>, vector<4x1xf32> -> vector<4x256xf32>
    %cst_69 = arith.constant 0.000000e+00 : f32
    %320 = vector.shape_cast %10 : vector<1x256xi1> to vector<1x256xi1>
    %321 = vector.broadcast %320 : vector<1x256xi1> to vector<4x256xi1>
    %322 = vector.broadcast %cst_69 : f32 to vector<4x256xf32>
    %323 = arith.select %321, %319, %322 : vector<4x256xi1>, vector<4x256xf32>
    %324 = vector.extract_strided_slice %224 {offsets = [0, 15], sizes = [4, 241], strides = [1, 1]} : vector<4x256xf32> to vector<4x241xf32>
    %325 = vector.extract_strided_slice %224 {offsets = [0, 0], sizes = [4, 15], strides = [1, 1]} : vector<4x256xf32> to vector<4x15xf32>
    %326 = tpu.concatenate %324, %325 in 1 : vector<4x241xf32>, vector<4x15xf32> -> vector<4x256xf32>
    %327 = arith.andi %6, %8 : vector<1x256xi1>
    %cst_70 = arith.constant 0.000000e+00 : f32
    %328 = vector.shape_cast %327 : vector<1x256xi1> to vector<1x256xi1>
    %329 = vector.broadcast %328 : vector<1x256xi1> to vector<4x256xi1>
    %330 = vector.broadcast %cst_70 : f32 to vector<4x256xf32>
    %331 = arith.select %329, %326, %330 : vector<4x256xi1>, vector<4x256xf32>
    %332 = vector.extract_strided_slice %224 {offsets = [0, 16], sizes = [4, 240], strides = [1, 1]} : vector<4x256xf32> to vector<4x240xf32>
    %333 = vector.extract_strided_slice %224 {offsets = [0, 0], sizes = [4, 16], strides = [1, 1]} : vector<4x256xf32> to vector<4x16xf32>
    %334 = tpu.concatenate %332, %333 in 1 : vector<4x240xf32>, vector<4x16xf32> -> vector<4x256xf32>
    %cst_71 = arith.constant 0.000000e+00 : f32
    %335 = vector.shape_cast %6 : vector<1x256xi1> to vector<1x256xi1>
    %336 = vector.broadcast %335 : vector<1x256xi1> to vector<4x256xi1>
    %337 = vector.broadcast %cst_71 : f32 to vector<4x256xf32>
    %338 = arith.select %336, %334, %337 : vector<4x256xi1>, vector<4x256xf32>
    %339 = vector.extract_strided_slice %224 {offsets = [0, 17], sizes = [4, 239], strides = [1, 1]} : vector<4x256xf32> to vector<4x239xf32>
    %340 = vector.extract_strided_slice %224 {offsets = [0, 0], sizes = [4, 17], strides = [1, 1]} : vector<4x256xf32> to vector<4x17xf32>
    %341 = tpu.concatenate %339, %340 in 1 : vector<4x239xf32>, vector<4x17xf32> -> vector<4x256xf32>
    %342 = arith.andi %6, %10 : vector<1x256xi1>
    %cst_72 = arith.constant 0.000000e+00 : f32
    %343 = vector.shape_cast %342 : vector<1x256xi1> to vector<1x256xi1>
    %344 = vector.broadcast %343 : vector<1x256xi1> to vector<4x256xi1>
    %345 = vector.broadcast %cst_72 : f32 to vector<4x256xf32>
    %346 = arith.select %344, %341, %345 : vector<4x256xi1>, vector<4x256xf32>
    %347 = tpu.concatenate %294, %301, %309, %316, %224, %323, %331, %338, %346 in 0 : vector<4x256xf32>, vector<4x256xf32>, vector<4x256xf32>, vector<4x256xf32>, vector<4x256xf32>, vector<4x256xf32>, vector<4x256xf32>, vector<4x256xf32>, vector<4x256xf32> -> vector<36x256xf32>
    %cst_73 = arith.constant dense<0.000000e+00> : vector<4x256xf32>
    %348 = tpu.matmul %12, %347, %cst_73 {dimension_numbers = #tpu.dot_dimension_numbers<[1], [0], [0], [1], [0, 0, 1, 1], [], []>} : vector<4x36xf32>, vector<36x256xf32>, vector<4x256xf32> -> vector<4x256xf32>
    %cst_74 = arith.constant dense<0.000000e+00> : vector<4xf32>
    %349 = vector.multi_reduction <add>, %286, %cst_74 [1] : vector<4x256xf32> to vector<4xf32>
    %350 = vector.shape_cast %349 : vector<4xf32> to vector<4x1xf32>
    %cst_75 = arith.constant 0.000000e+00 : f32
    %351 = vector.broadcast %cst_75 : f32 to vector<4x1xf32>
    %352 = arith.addf %351, %350 : vector<4x1xf32>
    %cst_76 = arith.constant dense<0.000000e+00> : vector<4xf32>
    %353 = vector.multi_reduction <add>, %348, %cst_76 [1] : vector<4x256xf32> to vector<4xf32>
    %354 = vector.shape_cast %353 : vector<4xf32> to vector<4x1xf32>
    %355 = arith.addf %352, %354 : vector<4x1xf32>
    %356 = arith.mulf %286, %286 : vector<4x256xf32>
    %cst_77 = arith.constant dense<0.000000e+00> : vector<4xf32>
    %357 = vector.multi_reduction <add>, %356, %cst_77 [1] : vector<4x256xf32> to vector<4xf32>
    %358 = vector.shape_cast %357 : vector<4xf32> to vector<4x1xf32>
    %cst_78 = arith.constant 0.000000e+00 : f32
    %359 = vector.broadcast %cst_78 : f32 to vector<4x1xf32>
    %360 = arith.addf %359, %358 : vector<4x1xf32>
    %361 = arith.mulf %348, %348 : vector<4x256xf32>
    %cst_79 = arith.constant dense<0.000000e+00> : vector<4xf32>
    %362 = vector.multi_reduction <add>, %361, %cst_79 [1] : vector<4x256xf32> to vector<4xf32>
    %363 = vector.shape_cast %362 : vector<4xf32> to vector<4x1xf32>
    %364 = arith.addf %360, %363 : vector<4x1xf32>
    %cst_80 = arith.constant 5.120000e+02 : f32
    %365 = vector.broadcast %cst_80 : f32 to vector<4x1xf32>
    %366 = arith.divf %355, %365 : vector<4x1xf32>
    %cst_81 = arith.constant 5.120000e+02 : f32
    %367 = vector.broadcast %cst_81 : f32 to vector<4x1xf32>
    %368 = arith.divf %364, %367 : vector<4x1xf32>
    %369 = arith.mulf %366, %366 : vector<4x1xf32>
    %370 = arith.subf %368, %369 : vector<4x1xf32>
    %cst_82 = arith.constant 0.000000e+00 : f32
    %371 = vector.broadcast %cst_82 : f32 to vector<4x1xf32>
    %372 = arith.maximumf %370, %371 : vector<4x1xf32>
    %cst_83 = arith.constant 9.99999974E-6 : f32
    %373 = vector.broadcast %cst_83 : f32 to vector<4x1xf32>
    %374 = arith.addf %372, %373 : vector<4x1xf32>
    %375 = math.rsqrt %374 : vector<4x1xf32>
    %376 = tpu.iota {dimensions = array<i32: 0>} : vector<4x1xi32>
    %cst_84 = arith.constant 0.000000e+00 : f32
    %377 = vector.broadcast %cst_84 : f32 to vector<4x1xf32>
    %c0_i32_85 = arith.constant 0 : i32
    %378 = vector.broadcast %c0_i32_85 : i32 to vector<4x1xi32>
    %379 = arith.cmpi eq, %376, %378 : vector<4x1xi32>
    %c2_86 = arith.constant 2 : index
    %c0_87 = arith.constant 0 : index
    %380 = memref.load %arg3[%c2_86, %c0_87] : memref<4x4xf32, #tpu.memory_space<smem>>
    %381 = vector.broadcast %380 : f32 to vector<4x1xf32>
    %382 = arith.select %379, %381, %377 : vector<4x1xi1>, vector<4x1xf32>
    %c1_i32_88 = arith.constant 1 : i32
    %383 = vector.broadcast %c1_i32_88 : i32 to vector<4x1xi32>
    %384 = arith.cmpi eq, %376, %383 : vector<4x1xi32>
    %c2_89 = arith.constant 2 : index
    %c1_90 = arith.constant 1 : index
    %385 = memref.load %arg3[%c2_89, %c1_90] : memref<4x4xf32, #tpu.memory_space<smem>>
    %386 = vector.broadcast %385 : f32 to vector<4x1xf32>
    %387 = arith.select %384, %386, %382 : vector<4x1xi1>, vector<4x1xf32>
    %c2_i32_91 = arith.constant 2 : i32
    %388 = vector.broadcast %c2_i32_91 : i32 to vector<4x1xi32>
    %389 = arith.cmpi eq, %376, %388 : vector<4x1xi32>
    %c2_92 = arith.constant 2 : index
    %c2_93 = arith.constant 2 : index
    %390 = memref.load %arg3[%c2_92, %c2_93] : memref<4x4xf32, #tpu.memory_space<smem>>
    %391 = vector.broadcast %390 : f32 to vector<4x1xf32>
    %392 = arith.select %389, %391, %387 : vector<4x1xi1>, vector<4x1xf32>
    %c3_i32_94 = arith.constant 3 : i32
    %393 = vector.broadcast %c3_i32_94 : i32 to vector<4x1xi32>
    %394 = arith.cmpi eq, %376, %393 : vector<4x1xi32>
    %c2_95 = arith.constant 2 : index
    %c3_96 = arith.constant 3 : index
    %395 = memref.load %arg3[%c2_95, %c3_96] : memref<4x4xf32, #tpu.memory_space<smem>>
    %396 = vector.broadcast %395 : f32 to vector<4x1xf32>
    %397 = arith.select %394, %396, %392 : vector<4x1xi1>, vector<4x1xf32>
    %398 = arith.mulf %397, %375 : vector<4x1xf32>
    %399 = tpu.iota {dimensions = array<i32: 0>} : vector<4x1xi32>
    %cst_97 = arith.constant 0.000000e+00 : f32
    %400 = vector.broadcast %cst_97 : f32 to vector<4x1xf32>
    %c0_i32_98 = arith.constant 0 : i32
    %401 = vector.broadcast %c0_i32_98 : i32 to vector<4x1xi32>
    %402 = arith.cmpi eq, %399, %401 : vector<4x1xi32>
    %c3_99 = arith.constant 3 : index
    %c0_100 = arith.constant 0 : index
    %403 = memref.load %arg3[%c3_99, %c0_100] : memref<4x4xf32, #tpu.memory_space<smem>>
    %404 = vector.broadcast %403 : f32 to vector<4x1xf32>
    %405 = arith.select %402, %404, %400 : vector<4x1xi1>, vector<4x1xf32>
    %c1_i32_101 = arith.constant 1 : i32
    %406 = vector.broadcast %c1_i32_101 : i32 to vector<4x1xi32>
    %407 = arith.cmpi eq, %399, %406 : vector<4x1xi32>
    %c3_102 = arith.constant 3 : index
    %c1_103 = arith.constant 1 : index
    %408 = memref.load %arg3[%c3_102, %c1_103] : memref<4x4xf32, #tpu.memory_space<smem>>
    %409 = vector.broadcast %408 : f32 to vector<4x1xf32>
    %410 = arith.select %407, %409, %405 : vector<4x1xi1>, vector<4x1xf32>
    %c2_i32_104 = arith.constant 2 : i32
    %411 = vector.broadcast %c2_i32_104 : i32 to vector<4x1xi32>
    %412 = arith.cmpi eq, %399, %411 : vector<4x1xi32>
    %c3_105 = arith.constant 3 : index
    %c2_106 = arith.constant 2 : index
    %413 = memref.load %arg3[%c3_105, %c2_106] : memref<4x4xf32, #tpu.memory_space<smem>>
    %414 = vector.broadcast %413 : f32 to vector<4x1xf32>
    %415 = arith.select %412, %414, %410 : vector<4x1xi1>, vector<4x1xf32>
    %c3_i32_107 = arith.constant 3 : i32
    %416 = vector.broadcast %c3_i32_107 : i32 to vector<4x1xi32>
    %417 = arith.cmpi eq, %399, %416 : vector<4x1xi32>
    %c3_108 = arith.constant 3 : index
    %c3_109 = arith.constant 3 : index
    %418 = memref.load %arg3[%c3_108, %c3_109] : memref<4x4xf32, #tpu.memory_space<smem>>
    %419 = vector.broadcast %418 : f32 to vector<4x1xf32>
    %420 = arith.select %417, %419, %415 : vector<4x1xi1>, vector<4x1xf32>
    %421 = arith.mulf %366, %398 : vector<4x1xf32>
    %422 = arith.subf %420, %421 : vector<4x1xf32>
    %423 = vector.broadcast %398 : vector<4x1xf32> to vector<4x256xf32>
    %424 = arith.mulf %286, %423 : vector<4x256xf32>
    %425 = vector.broadcast %422 : vector<4x1xf32> to vector<4x256xf32>
    %426 = arith.addf %424, %425 : vector<4x256xf32>
    %427 = arith.addf %426, %13 : vector<4x256xf32>
    %cst_110 = arith.constant 0.000000e+00 : f32
    %428 = vector.broadcast %cst_110 : f32 to vector<4x256xf32>
    %429 = arith.maximumf %427, %428 : vector<4x256xf32>
    %430 = vector.broadcast %398 : vector<4x1xf32> to vector<4x256xf32>
    %431 = arith.mulf %348, %430 : vector<4x256xf32>
    %432 = vector.broadcast %422 : vector<4x1xf32> to vector<4x256xf32>
    %433 = arith.addf %431, %432 : vector<4x256xf32>
    %434 = arith.addf %433, %14 : vector<4x256xf32>
    %cst_111 = arith.constant 0.000000e+00 : f32
    %435 = vector.broadcast %cst_111 : f32 to vector<4x256xf32>
    %436 = arith.maximumf %434, %435 : vector<4x256xf32>
    %437 = tpu.concatenate %429, %436 in 0 : vector<4x256xf32>, vector<4x256xf32> -> vector<8x256xf32>
    %c0_112 = arith.constant 0 : index
    %c0_113 = arith.constant 0 : index
    %438 = vector.load %arg4[%c0_112, %c0_113] : memref<8x256xf32, #tpu.memory_space<vmem>>, vector<8x256xf32>
    tpu.vector_store %arg4[%c0_112, %c0_113], %437 {strides = array<i32>} : memref<8x256xf32, #tpu.memory_space<vmem>>, vector<8x256xf32>,
    return
  }
}

</mosaic_0001>

<bundles_post_ra>
// kernel: tpu_custom_call.1
= control target key start
LH: loop header
LB: loop body
LE: loop exit
PB: predicated region body
PF: predicated region fallthrough
CT: control target
= control target key end

     0   :  { %9 = vsyncpa [#allocation3], 0  ;;  %s1883_s0 = inlined_call_operand.hbm [shape: f32[8,256], index: 0, kind: input, shape index: {}]   ;;  %s1884_s1 = inlined_call_operand.hbm [shape: f32[4,36], index: 1, kind: input, shape index: {}]   ;;  %s1885_s2 = inlined_call_operand.hbm [shape: f32[4,36], index: 2, kind: input, shape index: {}]   ;;  %s1886_s3 = inlined_call_operand.hbm [shape: f32[4,4], index: 3, kind: input, shape index: {}]   ;;  %s1887_s4 = inlined_call_operand.hbm [shape: f32[8,256], index: 4, kind: output, shape index: {}]  }
   0x1   :  { %10 = vsyncpa [#allocation7], 0 }
   0x2   :  { %11 = vsyncpa [#allocation5], 0  ;;  %s29_s17 = sshll.u32 %s1884_s1, 4  ;;  %s30_s17 = int_to_ptr.hbm [resolvable:$true] %s29_s17 }
   0x3   :  { %12 = vsyncpa [#allocation4], 0  ;;  %s1340_s18 = smov [#allocation6]   ;;  %s18_s22 = sshll.u32 %s1883_s0, 4  ;;  %s19_s22 = int_to_ptr.hbm [resolvable:$true] %s18_s22 }
   0x4   :  { %s31_s19 = sshll.u32 %s1340_s18, 4  ;;  %s1341_s23 = smov [#allocation2]   ;;  %s32_s19 = int_to_ptr.vmem [resolvable:$true] %s31_s19 }
   0x5   :  { %34 = dma.hbm_to_vmem [thread:$0]  %s30_s17, 64, %s32_s19, [#allocation7]  }
   0x6   :  { %s20_s24 = sshll.u32 %s1341_s23, 4  ;;  %s40_s27 = sshll.u32 %s1885_s2, 4  ;;  %s21_s24 = int_to_ptr.vmem [resolvable:$true] %s20_s24  ;;  %s41_s27 = int_to_ptr.hbm [resolvable:$true] %s40_s27 }
   0x7   :  { %23 = dma.hbm_to_vmem [thread:$0]  %s19_s22, 256, %s21_s24, [#allocation3]  }
   0x8   :  { %s51_s29 = sshll.u32 %s1886_s3, 4  ;;  %s1342_s30 = smov [#allocation8]   ;;  %s52_s29 = int_to_ptr.hbm [resolvable:$true] %s51_s29 }
   0x9   :  { %s42_s5 = sshll.u32 %s1342_s30, 4  ;;  %s1343_s0 = smov [#allocation9]   ;;  %s43_s5 = int_to_ptr.vmem [resolvable:$true] %s42_s5 }
   0xa   :  { %45 = dma.hbm_to_vmem [thread:$0]  %s41_s27, 64, %s43_s5, [#allocation7]  }
   0xb   :  { %54 = dma.hbm_to_smem %s52_s29, 64, %s1343_s0, [#allocation5]  }
   0xc   :  { %1332 = dma.done.wait [#allocation3], 256  }
   0xd   :  { %1333 = vsyncadd [#allocation3], 4294967040 }
   0xe   :  { %1334 = dma.done.wait [#allocation7], 128  }
   0xf   :  { %1335 = vsyncadd [#allocation7], 4294967168 }
  0x10   :  { %1336 = dma.done.wait [#allocation5], 64  }
  0x11   :  { %1337 = vsyncadd [#allocation5], 4294967232 }
  0x12   :  { %71 = sfence }
  0x13   :  { %v1391_v0 = vld [vmem:[#allocation2] sm:$0xf0]  ;;  %v1393_v1 = vld [vmem:[#allocation2 + $0x8] sm:$0xf0]  ;;  %s1344_s2 = smov 111   ;;  %s1345_s3 = smov 113   ;;  %v72_v9 = vlaneseq }
  0x14   :  { %391 = vrot.lane.b32.xlu0 %v1391_v0, %s1344_s2  ;;  %v1076_v2 = vpack.i.bf16 %v1393_v1, %v1391_v0  ;;  %v1086_v3 = vpack.i.bf16 %v1391_v0, %v1393_v1  ;;  %s1346_s6 = smov 15   ;;  %v1405_v4 = vld [vmem:[#allocation2] sm:$0xf]  ;;  %v1407_v5 = vld [vmem:[#allocation2 + $0x8] sm:$0xf]  ;;  %s1347_s7 = smov 112  }
  0x15   :  { %s1348_s8 = smov 127   ;;  %v1096_v6 = vpack.i.bf16 %v1407_v5, %v1405_v4  ;;  %s1349_s9 = smov 17   ;;  %v1126_v7 = vpack.i.bf16 %v1405_v4, %v1407_v5  ;;  %v1430_v10 = vand.u32 127, %v72_v9  ;;  %vm1891_vm3 = vcmask 924672  }
  0x16   :  { %1077 = vrot.lane.b32.xlu1 %v1076_v2, %s1345_s3  ;;  %1087 = vrot.lane.b32.xlu2 %v1086_v3, %s1346_s6  ;;  %s1350_s10 = smov 1   ;;  %s1351_s11 = smov 16   ;;  %vm1888_vm5 = vcmask 121856   ;;  %vm1889_vm7 = vcmask 1039360   ;;  %vm1890_vm8 = vcmask 908288   ;;  %vm1902_vm11 = vcmask 1043456  }
  0x17   :  { %v1433_v12 = vadd.s32 128, %v1430_v10  ;;  %v75_v14 = vand.u32 15, %v1430_v10  ;;  %vm1895_vm4 = vcmp.ge.s32.totalorder %v1430_v10, 16  ;;  %vm199_vm12 = vcmask 916480   ;;  %s534_s12 = sld [smem:[#allocation9]]  ;;  %s1353_s1 = smov [#allocation10]  }
  0x18   :  { %vm1893_vm14 = vcmask 7168   ;;  %v414_v35 = vrot.slane %v1391_v0, 4  ;;  %v415_v40 = vrot.slane %v1393_v1, 4  ;;  %s1039_s13 = sld [smem:[#allocation9 + $0x1]]  ;;  %s1017_s28 = sshll.u32 %s1353_s1, 4  ;;  %s1018_s28 = int_to_ptr.vmem [resolvable:$true] %s1017_s28 }
  0x19   :  { %v76_v13 = vand.u32 15, %v1433_v12  ;;  %vm1897_vm0 = vcmp.lt.s32.totalorder %v1433_v12, 240  ;;  %vm1442_vm2 = vcmp.lt.s32.totalorder %v75_v14, 15  ;;  %vm1451_vm9 = vcmp.ge.s32.totalorder %v75_v14, 1  ;;  %s1042_s14 = sld [smem:[#allocation9 + $0x80]]  ;;  %s1019_s5 = sshll.u32 %s1887_s4, 4  ;;  %s1020_s5 = int_to_ptr.hbm [resolvable:$true] %s1019_s5 }
  0x1a   :  { %vm1459_vm10 = vmand %vm1895_vm4, %vm1442_vm2  ;;  %s1040_s15 = sld [smem:[#allocation9 + $0x2]] }
  0x1b   :  { %vm1438_vm1 = vcmp.ge.s32.totalorder %v76_v13, 1  ;;  %vm1447_vm6 = vcmp.lt.s32.totalorder %v76_v13, 15  ;;  %s1043_s16 = sld [smem:[#allocation9 + $0x81]] }
  0x1c   :  { %393 = vrot.lane.b32.xlu0 %v1393_v1, %s1344_s2  ;;  %vm1469_vm13 = vmand %vm1897_vm0, %vm1438_vm1  ;;  %s1041_s17 = sld [smem:[#allocation9 + $0x3]] }
  0x1d   :  { %vm1477_vm15 = vmand %vm1897_vm0, %vm1447_vm6  ;;  %s1044_s18 = sld [smem:[#allocation9 + $0x82]] }
  0x1e   :  { %1082 = vrot.lane.b32.xlu1 %v1076_v2, %s1347_s7  ;;  %1092 = vrot.lane.b32.xlu2 %v1076_v2, %s1348_s8  ;;  %s1045_s19 = sld [smem:[#allocation9 + $0x83]] }
  0x1f   :  { %s1054_s20 = sld [smem:[#allocation9 + $0x100]] }
  0x20   :  { %s1055_s21 = sld [smem:[#allocation9 + $0x101]] }
  0x21   :  { %s1058_s22 = sld [smem:[#allocation9 + $0x180]] }
  0x22   :  { %s1056_s23 = sld [smem:[#allocation9 + $0x102]] }
  0x23   :  { %s1059_s24 = sld [smem:[#allocation9 + $0x181]] }
  0x24   :  { %1097 = vrot.lane.b32.xlu0 %v1096_v6, %s1347_s7  ;;  %s1057_s25 = sld [smem:[#allocation9 + $0x103]] }
  0x25   :  { %s1060_s26 = sld [smem:[#allocation9 + $0x182]] }
  0x26   :  { %1102 = vrot.lane.b32.xlu1 %v1086_v3, %s1349_s9  ;;  %1107 = vrot.lane.b32.xlu2 %v1086_v3, %s1350_s10  ;;  %s1061_s27 = sld [smem:[#allocation9 + $0x183]] }
  0x2c   :  { %211 = vrot.lane.b32.xlu0 %v1405_v4, %s1344_s2 }
  0x2e   :  { %213 = vrot.lane.b32.xlu1 %v1407_v5, %s1344_s2  ;;  %1112 = vrot.lane.b32.xlu2 %v1096_v6, %s1348_s8 }
  0x34   :  { %1117 = vrot.lane.b32.xlu0 %v1096_v6, %s1345_s3 }
  0x36   :  { %1122 = vrot.lane.b32.xlu1 %v1086_v3, %s1351_s11  ;;  %1127 = vrot.lane.b32.xlu2 %v1126_v7, %s1350_s10 }
  0x3c   :  { %1132 = vrot.lane.b32.xlu0 %v1126_v7, %s1351_s11 }
  0x3e   :  { %1137 = vrot.lane.b32.xlu1 %v1126_v7, %s1346_s6  ;;  %1142 = vrot.lane.b32.xlu2 %v1126_v7, %s1349_s9 }
  0x70   :  { %v1088_v8 = vpop.permute.xlu2 %1087 }
  0x71   :  { %v1090_v16 = vunpack.i.h.bf16 %v1088_v8  ;;  %v1089_v17 = vunpack.i.l.bf16 %v1088_v8 }
  0x73   :  { %v344_v29 = vsel %vm1888_vm5, %v1089_v17, %v1090_v16  ;;  %v341_v36 = vsel %vm1888_vm5, %v1090_v16, %v1089_v17  ;;  %vm1892_vm5 = vcmask 138240  }
  0x74   :  { %v345_v41 = vsel %vm1459_vm10, %v344_v29, 0.0  ;;  %v346_v59 = vsel %vm1447_vm6, %v341_v36, 0.0 }
  0x75   :  { %v410_v7 = vrot.slane %v345_v41, 4  ;;  %v411_v14 = vrot.slane %v346_v59, 4 }
  0x78   :  { %v1093_v11 = vpop.permute.xlu2 %1092 }
  0x79   :  { %v1095_v21 = vunpack.i.h.bf16 %v1093_v11  ;;  %v1094_v22 = vunpack.i.l.bf16 %v1093_v11 }
  0x7b   :  { %v362_v34 = vsel %vm1889_vm7, %v1094_v22, %v1095_v21  ;;  %v366_v45 = vsel %vm1889_vm7, %v1095_v21, %v1094_v22 }
  0x7c   :  { %v367_v50 = vsel %vm1442_vm2, %v362_v34, 0.0  ;;  %v368_v57 = vsel %vm1447_vm6, %v366_v45, 0.0 }
  0x7d   :  { %v432_v6 = vsel %vm1902_vm11, %v414_v35, %v367_v50  ;;  %v433_v11 = vsel %vm1902_vm11, %v415_v40, %v368_v57 }
  0x80   :  { %v1108_v25 = vpop.permute.xlu2 %1107 }
  0x81   :  { %v1110_v37 = vunpack.i.h.bf16 %v1108_v25  ;;  %v1109_v38 = vunpack.i.l.bf16 %v1108_v25 }
  0x83   :  { %v355_v58 = vsel %vm1893_vm14, %v1109_v38, %v1110_v37  ;;  %v352_v63 = vsel %vm1893_vm14, %v1110_v37, %v1109_v38 }
  0x84   :  { %v356_v13 = vsel %vm1451_vm9, %v355_v58, 0.0  ;;  %v357_v16 = vsel %vm1438_vm1, %v352_v63, 0.0 }
  0x85   :  { %v431_v21 = vsel %vm1902_vm11, %v411_v14, %v357_v16 }
  0x86   :  { %v392_v15 = vpop.permute.xlu0 %391 }
  0x88   :  { %v1078_v19 = vpop.permute.xlu1 %1077  ;;  %v1113_v55 = vpop.permute.xlu2 %1112 }
  0x89   :  { %v1080_v23 = vunpack.i.h.bf16 %v1078_v19  ;;  %v1079_v24 = vunpack.i.l.bf16 %v1078_v19  ;;  %v430_v19 = vsel %vm1902_vm11, %v410_v7, %v356_v13 }
  0x8b   :  { %v373_v30 = vsel %vm1891_vm3, %v1079_v24, %v1080_v23  ;;  %v377_v33 = vsel %vm1891_vm3, %v1080_v23, %v1079_v24  ;;  %v1115_v23 = vunpack.i.h.bf16 %v1113_v55  ;;  %v1114_v24 = vunpack.i.l.bf16 %v1113_v55 }
  0x8c   :  { %v378_v44 = vsel %vm1451_vm9, %v373_v30, 0.0  ;;  %v379_v49 = vsel %vm1469_vm13, %v377_v33, 0.0 }
  0x8d   :  { %v420_v56 = vrot.slane %v378_v44, 4  ;;  %v421_v62 = vrot.slane %v379_v49, 4  ;;  %v166_v37 = vsel %vm1889_vm7, %v1114_v24, %v1115_v23  ;;  %v170_v38 = vsel %vm1889_vm7, %v1115_v23, %v1114_v24  ;;  %vm1551_vm7 = vmand %vm1895_vm4, %vm1451_vm9 }
  0x8e   :  { %v394_v39 = vpop.permute.xlu0 %393 }
  0x8f   :  { %v395_v42 = vsel %vm1890_vm8, %v392_v15, %v394_v39  ;;  %v399_v43 = vsel %vm1890_vm8, %v394_v39, %v392_v15 }
  0x90   :  { %v1083_v46 = vpop.permute.xlu1 %1082  ;;  %v400_v47 = vsel %vm1442_vm2, %v395_v42, 0.0  ;;  %v401_v48 = vsel %vm1477_vm15, %v399_v43, 0.0  ;;  %v1527_v22 = vpop.permute.xlu2 %1127 }
  0x91   :  { %v1085_v51 = vunpack.i.h.bf16 %v1083_v46  ;;  %v1084_v52 = vunpack.i.l.bf16 %v1083_v46  ;;  %v426_v53 = vrot.slane %v400_v47, 4  ;;  %v427_v54 = vrot.slane %v401_v48, 4 }
  0x92   :  { %v1130_v42 = vunpack.i.h.bf16 %v1527_v22  ;;  %v1129_v45 = vunpack.i.l.bf16 %v1527_v22  ;;  %v175_v47 = vsel %vm1442_vm2, %v166_v37, 0.0  ;;  %v176_v48 = vsel %vm1447_vm6, %v170_v38, 0.0 }
  0x93   :  { %1035 = vmatpush.msk.msra.mxu2 %vm1902_vm11, %v426_v53  ;;  %1037 = vmatpush.msk.msra.mxu3 %vm1902_vm11, %v427_v54  ;;  %v384_v60 = vsel %vm199_vm12, %v1084_v52, %v1085_v51  ;;  %v388_v61 = vsel %vm199_vm12, %v1085_v51, %v1084_v52  ;;  %v244_v57 = vrot.slane %v176_v48, 4 }
  0x94   :  { %v434_v2 = vsel %vm1902_vm11, %v420_v56, %v384_v60  ;;  %v390_v3 = vsel %vm1897_vm0, %v388_v61, 0.0  ;;  %v243_v56 = vrot.slane %v175_v47, 4  ;;  %v154_v58 = vsel %vm1893_vm14, %v1129_v45, %v1130_v42 }
  0x95   :  { %452 = vmatpush.msra.mxu2 %v434_v2  ;;  %v435_v8 = vsel %vm1902_vm11, %v421_v62, %v390_v3  ;;  %v159_v37 = vsel %vm1451_vm9, %v154_v58, 0.0  ;;  %v151_v38 = vsel %vm1893_vm14, %v1130_v42, %v1129_v45 }
  0x96   :  { %v1098_v15 = vpop.permute.xlu0 %1097  ;;  %472 = vmatpush.msra.mxu3 %v435_v8  ;;  %v160_v47 = vsel %vm1438_vm1, %v151_v38, 0.0 }
  0x97   :  { %453 = vmatpush.msra.mxu2 %v432_v6  ;;  %v1100_v25 = vunpack.i.h.bf16 %v1098_v15  ;;  %v1099_v29 = vunpack.i.l.bf16 %v1098_v15 }
  0x98   :  { %v1103_v17 = vpop.permute.xlu1 %1102  ;;  %473 = vmatpush.msra.mxu3 %v433_v11  ;;  %v1143_v54 = vpop.permute.xlu2 %1142 }
  0x99   :  { %454 = vmatpush.msra.mxu2 %v430_v19  ;;  %v1105_v33 = vunpack.i.h.bf16 %v1103_v17  ;;  %v1104_v34 = vunpack.i.l.bf16 %v1103_v17  ;;  %v204_v46 = vsel %vm199_vm12, %v1100_v25, %v1099_v29  ;;  %v200_v52 = vsel %vm199_vm12, %v1099_v29, %v1100_v25 }
  0x9a   :  { %474 = vmatpush.msra.mxu3 %v431_v21  ;;  %v210_v53 = vsel %vm1897_vm0, %v204_v46, 0.0  ;;  %v249_v2 = vrot.slane %v200_v52, 4  ;;  %v1145_v6 = vunpack.i.h.bf16 %v1143_v54  ;;  %v1144_v7 = vunpack.i.l.bf16 %v1143_v54 }
  0x9b   :  { %v319_v49 = vsel %vm1892_vm5, %v1105_v33, %v1104_v34  ;;  %v322_v51 = vsel %vm1892_vm5, %v1104_v34, %v1105_v33  ;;  %v250_v3 = vrot.slane %v210_v53, 4  ;;  %v258_v29 = vsel %vm1902_vm11, %v1405_v4, %v243_v56  ;;  %v85_v33 = vld [vmem:[#allocation6] sm:$0xf] }
  0x9c   :  { %v324_v61 = vsel %vm1438_vm1, %v319_v49, 0.0  ;;  %v323_v62 = vsel %vm1551_vm7, %v322_v51, 0.0  ;;  %v259_v34 = vsel %vm1902_vm11, %v1407_v5, %v244_v57  ;;  %v237_v46 = vrot.slane %v159_v37, 4 }
  0x9d   :  { %v405_v17 = vrot.slane %v324_v61, 4  ;;  %v404_v19 = vrot.slane %v323_v62, 4  ;;  %v238_v57 = vrot.slane %v160_v47, 4 }
  0x9e   :  { %v212_v30 = vpop.permute.xlu0 %211 }
  0xa0   :  { %v214_v36 = vpop.permute.xlu1 %213 }
  0xa1   :  { %v216_v39 = vsel %vm1890_vm8, %v212_v30, %v214_v36  ;;  %v220_v41 = vsel %vm1890_vm8, %v214_v36, %v212_v30  ;;  %vm1896_vm8 = vcmask 130048  }
  0xa2   :  { %v227_v43 = vsel %vm1442_vm2, %v216_v39, 0.0  ;;  %v228_v44 = vsel %vm1477_vm15, %v220_v41, 0.0 }
  0xa3   :  { %1031 = vmatpush.msk.msra.mxu0 %vm1902_vm11, %v227_v43  ;;  %1033 = vmatpush.msk.msra.mxu1 %vm1902_vm11, %v228_v44  ;;  %v102_v43 = vsel %vm1892_vm5, %v1144_v7, %v1145_v6  ;;  %v99_v44 = vsel %vm1892_vm5, %v1145_v6, %v1144_v7  ;;  %vm1919_vm5 = vcmask 121856  }
  0xa4   :  { %v109_v51 = vsel %vm1551_vm7, %v102_v43, 0.0  ;;  %v110_v53 = vsel %vm1438_vm1, %v99_v44, 0.0  ;;  %vm1920_vm14 = vmmov %vm1919_vm5 }
  0xa6   :  { %v1118_v55 = vpop.permute.xlu0 %1117 }
  0xa7   :  { %v1120_v59 = vunpack.i.h.bf16 %v1118_v55  ;;  %v1119_v60 = vunpack.i.l.bf16 %v1118_v55 }
  0xa8   :  { %v1123_v63 = vpop.permute.xlu1 %1122 }
  0xa9   :  { %v1125_v8 = vunpack.i.h.bf16 %v1123_v63  ;;  %v1124_v11 = vunpack.i.l.bf16 %v1123_v63  ;;  %v182_v13 = vsel %vm1891_vm3, %v1119_v60, %v1120_v59  ;;  %v186_v14 = vsel %vm1891_vm3, %v1120_v59, %v1119_v60 }
  0xaa   :  { %v193_v15 = vsel %vm1451_vm9, %v182_v13, 0.0  ;;  %v194_v16 = vsel %vm1469_vm13, %v186_v14, 0.0  ;;  %vm1894_vm3 = vcmask 293888  }
  0xab   :  { %v260_v21 = vsel %vm1902_vm11, %v193_v15, %v249_v2  ;;  %v261_v22 = vsel %vm1902_vm11, %v194_v16, %v250_v3  ;;  %v330_v23 = vsel %vm1896_vm8, %v1125_v8, %v1124_v11  ;;  %v333_v24 = vsel %vm1896_vm8, %v1124_v11, %v1125_v8 }
  0xac   :  { %284 = vmatpush.msra.mxu0 %v260_v21  ;;  %304 = vmatpush.msra.mxu1 %v261_v22  ;;  %v429_v25 = vsel %vm1902_vm11, %v405_v17, %v330_v23  ;;  %v334_v30 = vsel %vm1895_vm4, %v333_v24, 0.0 }
  0xad   :  { %475 = vmatpush.msra.mxu3 %v429_v25  ;;  %v428_v36 = vsel %vm1902_vm11, %v404_v19, %v334_v30 }
  0xae   :  { %285 = vmatpush.msra.mxu0 %v258_v29  ;;  %305 = vmatpush.msra.mxu1 %v259_v34  ;;  %v1133_v39 = vpop.permute.xlu0 %1132 }
  0xaf   :  { %455 = vmatpush.msra.mxu2 %v428_v36  ;;  %v1135_v4 = vunpack.i.h.bf16 %v1133_v39  ;;  %v1134_v41 = vunpack.i.l.bf16 %v1133_v39  ;;  %1038 = vmatmul.msk.f32.vlgmr.msra.gmra.mxu3 %vm1894_vm3, %v85_v33  ;;  %v1352_v36 = vmov 512.0  }
  0xb0   :  { %v1138_v5 = vpop.permute.xlu1 %1137  ;;  %1036 = vmatmul.msk.f32.vlgmr.msra.gmra.mxu2 %vm1894_vm3, %v85_v33  ;;  %1216 = vrcp.f32 %v1352_v36 }
  0xb1   :  { %v1140_v42 = vunpack.i.h.bf16 %v1138_v5  ;;  %v1139_v45 = vunpack.i.l.bf16 %v1138_v5  ;;  %v120_v48 = vsel %vm1896_vm8, %v1134_v41, %v1135_v4  ;;  %v117_v49 = vsel %vm1896_vm8, %v1135_v4, %v1134_v41 }
  0xb2   :  { %v125_v52 = vsel %vm1895_vm4, %v120_v48, 0.0  ;;  %v232_v54 = vrot.slane %v117_v49, 4 }
  0xb3   :  { %v136_v55 = vsel %vm1919_vm5, %v1139_v45, %v1140_v42  ;;  %v133_v56 = vsel %vm1920_vm14, %v1140_v42, %v1139_v45  ;;  %v231_v58 = vrot.slane %v125_v52, 4 }
  0xb4   :  { %v143_v59 = vsel %vm1459_vm10, %v136_v55, 0.0  ;;  %v144_v60 = vsel %vm1447_vm6, %v133_v56, 0.0  ;;  %v255_v2 = vsel %vm1902_vm11, %v110_v53, %v232_v54  ;;  %v1644_v55 = vshrl.u32 %v72_v9, 7 }
  0xb5   :  { %v256_v61 = vsel %vm1902_vm11, %v143_v59, %v237_v46  ;;  %v257_v62 = vsel %vm1902_vm11, %v144_v60, %v238_v57  ;;  %v254_v63 = vsel %vm1902_vm11, %v109_v51, %v231_v58  ;;  %v535_v56 = vstv %s534_s12 }
  0xb6   :  { %286 = vmatpush.msra.mxu0 %v256_v61  ;;  %306 = vmatpush.msra.mxu1 %v257_v62  ;;  %v1217_v37 = vpop.eup %1216  ;;  %vm1898_vm14 = vcmp.eq.s32.totalorder %v1644_v55, 0  ;;  %v539_v59 = vstv %s1039_s13  ;;  %v551_v60 = vstv %s1042_s14  ;;  %v543_v62 = vstv %s1040_s15 }
  0xb7   :  { %v509_v38 = vmul.f32 512.0, %v1217_v37  ;;  %vm513_vm5 = vweird.f32 %v1217_v37  ;;  %v536_v58 = vsel %vm1898_vm14, %v535_v56, 0.0  ;;  %vm1899_vm4 = vcmp.eq.s32.totalorder %v1644_v55, 3 }
  0xb8   :  { %287 = vmatpush.msra.mxu0 %v254_v63  ;;  %307 = vmatpush.msra.mxu1 %v255_v2  ;;  %v552_v2 = vsel %vm1898_vm14, %v551_v60, 0.0 }
  0xb9   :  { %1032 = vmatmul.msk.f32.vlgmr.msra.gmra.mxu0 %vm1894_vm3, %v85_v33  ;;  %1034 = vmatmul.msk.f32.vlgmr.msra.gmra.mxu1 %vm1894_vm3, %v85_v33  ;;  %v510_v39 = vsub.f32 1.0, %v509_v38  ;;  %vm1900_vm3 = vcmp.eq.s32.totalorder %v1644_v55, 2 }
  0xbb   :  { %v511_v4 = vmul.f32 %v1217_v37, %v510_v39 }
  0xbd   :  { %v512_v43 = vadd.f32 %v1217_v37, %v511_v4 }
  0xbf   :  { %v1639_v47 = vsel %vm513_vm5, %v1217_v37, %v512_v43  ;;  %vm1901_vm5 = vcmp.eq.s32.totalorder %v1644_v55, 1 }
  0xc0   :  { %v540_v9 = vsel %vm1901_vm5, %v539_v59, %v536_v58 }
 0x132   :  { %v1611_v3 = vpop.f32.mrf.mxu3 }
 0x133   :  { %v1613_v6 = vpop.f32.mrf.mxu2  ;;  %v487_v7 = vsel %vm1902_vm11, %v1611_v3, 0.0  ;;  %v501_v23 = vmul.f32 %v1611_v3, %v1611_v3 }
 0x134   :  { %v486_v8 = vsel %vm1902_vm11, %v1613_v6, 0.0  ;;  %v500_v22 = vmul.f32 %v1613_v6, %v1613_v6 }
 0x135   :  { %v488_v11 = vadd.f32 %v487_v7, %v486_v8  ;;  %v503_v33 = vsel %vm1902_vm11, %v501_v23, 0.0  ;;  %v554_v7 = vstv %s1043_s16 }
 0x136   :  { %v1619_v13 = vpop.f32.mrf.mxu0  ;;  %v1621_v14 = vpop.f32.mrf.mxu1  ;;  %v502_v30 = vsel %vm1902_vm11, %v500_v22, 0.0 }
 0x137   :  { %v492_v15 = vmul.f32 %v1619_v13, %v1619_v13  ;;  %v493_v16 = vmul.f32 %v1621_v14, %v1621_v14  ;;  %489 = vadd.xlane.f32.xlu1 %v488_v11  ;;  %v480_v17 = vsel %vm1902_vm11, %v1619_v13, 0.0  ;;  %v481_v19 = vsel %vm1902_vm11, %v1621_v14, 0.0 }
 0x138   :  { %v482_v21 = vadd.f32 %v481_v19, %v480_v17  ;;  %v504_v34 = vadd.f32 %v503_v33, %v502_v30  ;;  %v544_v11 = vsel %vm1900_vm3, %v543_v62, %v540_v9  ;;  %v557_v17 = vstv %s1044_s18 }
 0x139   :  { %v494_v24 = vsel %vm1902_vm11, %v492_v15, 0.0  ;;  %v495_v25 = vsel %vm1902_vm11, %v493_v16, 0.0  ;;  %v547_v15 = vstv %s1041_s17  ;;  %v555_v16 = vsel %vm1901_vm5, %v554_v7, %v552_v2 }
 0x13a   :  { %483 = vadd.xlane.f32.xlu0 %v482_v21  ;;  %v496_v29 = vadd.f32 %v495_v25, %v494_v24  ;;  %v548_v21 = vsel %vm1899_vm4, %v547_v15, %v544_v11  ;;  %v558_v23 = vsel %vm1900_vm3, %v557_v17, %v555_v16  ;;  %v560_v24 = vstv %s1045_s19 }
 0x13b   :  { %v561_v30 = vsel %vm1899_vm4, %v560_v24, %v558_v23  ;;  %vm1932_vm5 = vcmask 908288  }
 0x13c   :  { %497 = vadd.xlane.f32.xlu2 %v496_v29 }
 0x144   :  { %505 = vadd.xlane.f32.xlu2 %v504_v34 }
 0x1aa   :  { %v490_v41 = vpop.xlane.xlu1 %489 }
 0x1ad   :  { %v484_v44 = vpop.xlane.xlu0 %483 }
 0x1ae   :  { %v491_v46 = vadd.f32 %v490_v41, %v484_v44 }
 0x1af   :  { %v498_v5 = vpop.xlane.xlu2 %497 }
 0x1b0   :  { %v515_v42 = vmul.f32 %v1639_v47, %v491_v46 }
 0x1b2   :  { %v517_v49 = vmul.f32 %v515_v42, %v515_v42 }
 0x1b7   :  { %v506_v45 = vpop.xlane.xlu2 %505 }
 0x1b8   :  { %v507_v48 = vadd.f32 %v506_v45, %v498_v5 }
 0x1ba   :  { %v516_v51 = vmul.f32 %v1639_v47, %v507_v48 }
 0x1bc   :  { %v518_v52 = vsub.f32 %v516_v51, %v517_v49 }
 0x1be   :  { %v519_v53 = vmax.f32 %v518_v52, 0.0 }
 0x1c0   :  { %v520_v54 = vadd.f32 1e-05, %v519_v53 }
 0x1c2   :  { %1218 = vrsqrt.f32 %v520_v54  ;;  %vm527_vm0 = vweird.f32 %v520_v54 }
 0x1c8   :  { %v1219_v57 = vpop.eup %1218 }
 0x1c9   :  { %v522_v61 = vmul.f32 %v1219_v57, %v520_v54  ;;  %vm528_vm8 = vweird.f32 %v1219_v57 }
 0x1ca   :  { %vm529_vm14 = vmor %vm527_vm0, %vm528_vm8  ;;  %vm1921_vm0 = vcmask 908288  }
 0x1cb   :  { %v523_v63 = vmul.f32 %v1219_v57, %v522_v61  ;;  %vm1922_vm8 = vmmov %vm1921_vm0 }
 0x1cd   :  { %v524_v8 = vmul.f32 0.5, %v523_v63 }
 0x1cf   :  { %v525_v19 = vsub.f32 1.5, %v524_v8 }
 0x1d1   :  { %v526_v22 = vmul.f32 %v1219_v57, %v525_v19 }
 0x1d3   :  { %v530_v25 = vsel %vm529_vm14, %v1219_v57, %v526_v22  ;;  %vm1923_vm14 = vcmp.lt.s32.totalorder %v1433_v12, 240 }
 0x1d4   :  { %v549_v29 = vmul.f32 %v548_v21, %v530_v25 }
 0x1d6   :  { %v562_v33 = vmul.f32 %v549_v29, %v515_v42  ;;  %v570_v36 = vmul.f32 %v549_v29, %v1613_v6  ;;  %v571_v37 = vmul.f32 %v549_v29, %v1611_v3  ;;  %v564_v38 = vmul.f32 %v549_v29, %v1619_v13 }
 0x1d7   :  { %v565_v39 = vmul.f32 %v549_v29, %v1621_v14 }
 0x1d8   :  { %v563_v34 = vsub.f32 %v561_v30, %v562_v33 }
 0x1da   :  { %v572_v4 = vadd.f32 %v570_v36, %v563_v34  ;;  %v573_v41 = vadd.f32 %v571_v37, %v563_v34  ;;  %v566_v43 = vadd.f32 %v564_v38, %v563_v34  ;;  %v567_v44 = vadd.f32 %v565_v39, %v563_v34 }
 0x1dc   :  { %v1670_v5 = vmax.f32 %v572_v4, 0.0  ;;  %v1672_v46 = vmax.f32 %v573_v41, 0.0  ;;  %v1680_v6 = vmax.f32 %v566_v43, 0.0  ;;  %v1682_v13 = vmax.f32 %v567_v44, 0.0 }
 0x1de   :  { %828 = vrot.lane.b32.xlu2 %v1672_v46, %s1344_s2  ;;  %826 = vrot.lane.b32.xlu1 %v1670_v5, %s1344_s2  ;;  %v1146_v3 = vpack.i.bf16 %v1672_v46, %v1670_v5  ;;  %v1166_v14 = vpack.i.bf16 %v1682_v13, %v1680_v6  ;;  %v1171_v42 = vpack.i.bf16 %v1670_v5, %v1672_v46 }
 0x1df   :  { %v1201_v45 = vpack.i.bf16 %v1680_v6, %v1682_v13 }
 0x1e0   :  { %1147 = vrot.lane.b32.xlu0 %v1146_v3, %s1347_s7 }
 0x1e6   :  { %1157 = vrot.lane.b32.xlu1 %v1146_v3, %s1345_s3  ;;  %1167 = vrot.lane.b32.xlu2 %v1166_v14, %s1347_s7 }
 0x1e8   :  { %1152 = vrot.lane.b32.xlu0 %v1146_v3, %s1348_s8 }
 0x1ee   :  { %1172 = vrot.lane.b32.xlu1 %v1171_v42, %s1351_s11  ;;  %655 = vrot.lane.b32.xlu2 %v1680_v6, %s1344_s2 }
 0x1f0   :  { %1162 = vrot.lane.b32.xlu0 %v1171_v42, %s1350_s10 }
 0x1f6   :  { %657 = vrot.lane.b32.xlu1 %v1682_v13, %s1344_s2  ;;  %1187 = vrot.lane.b32.xlu2 %v1166_v14, %s1345_s3 }
 0x1f8   :  { %1177 = vrot.lane.b32.xlu0 %v1171_v42, %s1346_s6 }
 0x1fe   :  { %1192 = vrot.lane.b32.xlu1 %v1171_v42, %s1349_s9  ;;  %1202 = vrot.lane.b32.xlu2 %v1201_v45, %s1351_s11 }
 0x200   :  { %1182 = vrot.lane.b32.xlu0 %v1166_v14, %s1348_s8 }
 0x206   :  { %1207 = vrot.lane.b32.xlu1 %v1201_v45, %s1346_s6 }
 0x208   :  { %1197 = vrot.lane.b32.xlu0 %v1201_v45, %s1350_s10 }
 0x210   :  { %1212 = vrot.lane.b32.xlu0 %v1201_v45, %s1349_s9 }
 0x238   :  { %v829_v48 = vpop.permute.xlu2 %828 }
 0x240   :  { %v1168_v49 = vpop.permute.xlu2 %1167 }
 0x241   :  { %v1170_v33 = vunpack.i.h.bf16 %v1168_v49  ;;  %v1169_v34 = vunpack.i.l.bf16 %v1168_v49 }
 0x243   :  { %v652_v45 = vsel %vm199_vm12, %v1170_v33, %v1169_v34 }
 0x248   :  { %v656_v60 = vpop.permute.xlu2 %655 }
 0x250   :  { %v827_v51 = vpop.permute.xlu1 %826  ;;  %v1188_v38 = vpop.permute.xlu2 %1187 }
 0x251   :  { %v830_v52 = vsel %vm1921_vm0, %v827_v51, %v829_v48  ;;  %v834_v53 = vsel %vm1922_vm8, %v829_v48, %v827_v51  ;;  %vm1924_vm0 = vcmask 924672   ;;  %v1190_v3 = vunpack.i.h.bf16 %v1188_v38 }
 0x252   :  { %v1148_v54 = vpop.permute.xlu0 %1147  ;;  %v835_v56 = vsel %vm1442_vm2, %v830_v52, 0.0  ;;  %v836_v57 = vsel %vm1477_vm15, %v834_v53, 0.0  ;;  %vm1925_vm8 = vmmov %vm1924_vm0  ;;  %v1189_v14 = vunpack.i.l.bf16 %v1188_v38  ;;  %v648_v51 = vsel %vm199_vm12, %v1169_v34, %v1170_v33 }
 0x253   :  { %v1150_v58 = vunpack.i.h.bf16 %v1148_v54  ;;  %v1149_v59 = vunpack.i.l.bf16 %v1148_v54  ;;  %1050 = vmatpush.msk.msrb.mxu2 %vm1902_vm11, %v835_v56  ;;  %1052 = vmatpush.msk.msrb.mxu3 %vm1902_vm11, %v836_v57 }
 0x254   :  { %v637_v53 = vsel %vm1924_vm0, %v1189_v14, %v1190_v3 }
 0x255   :  { %v823_v61 = vsel %vm199_vm12, %v1150_v58, %v1149_v59  ;;  %v819_v9 = vsel %vm199_vm12, %v1149_v59, %v1150_v58  ;;  %v686_v59 = vrot.slane %v648_v51, 4 }
 0x256   :  { %v825_v62 = vsel %vm1923_vm14, %v823_v61, 0.0  ;;  %v857_v11 = vrot.slane %v819_v9, 4  ;;  %vm1926_vm14 = vcmask 1039360  }
 0x257   :  { %v858_v15 = vrot.slane %v825_v62, 4  ;;  %vm1927_vm4 = vmmov %vm1926_vm14 }
 0x258   :  { %v1158_v63 = vpop.permute.xlu1 %1157 }
 0x259   :  { %v1160_v2 = vunpack.i.h.bf16 %v1158_v63  ;;  %v1159_v7 = vunpack.i.l.bf16 %v1158_v63 }
 0x25a   :  { %v1153_v8 = vpop.permute.xlu0 %1152 }
 0x25b   :  { %v1155_v16 = vunpack.i.h.bf16 %v1153_v8  ;;  %v1154_v17 = vunpack.i.l.bf16 %v1153_v8  ;;  %v808_v19 = vsel %vm1924_vm0, %v1159_v7, %v1160_v2  ;;  %v812_v21 = vsel %vm1925_vm8, %v1160_v2, %v1159_v7  ;;  %vm1929_vm8 = vmmov %vm1924_vm0 }
 0x25c   :  { %v813_v22 = vsel %vm1451_vm9, %v808_v19, 0.0  ;;  %v814_v23 = vsel %vm1469_vm13, %v812_v21, 0.0 }
 0x25d   :  { %v867_v24 = vsel %vm1902_vm11, %v813_v22, %v857_v11  ;;  %v868_v25 = vsel %vm1902_vm11, %v814_v23, %v858_v15  ;;  %v797_v29 = vsel %vm1926_vm14, %v1154_v17, %v1155_v16  ;;  %v801_v30 = vsel %vm1927_vm4, %v1155_v16, %v1154_v17 }
 0x25e   :  { %887 = vmatpush.msrb.mxu2 %v867_v24  ;;  %907 = vmatpush.msrb.mxu3 %v868_v25  ;;  %v802_v36 = vsel %vm1442_vm2, %v797_v29, 0.0  ;;  %v803_v37 = vsel %vm1447_vm6, %v801_v30, 0.0  ;;  %vm1928_vm4 = vcmp.lt.s32.totalorder %v1433_v12, 240  ;;  %vm1930_vm14 = vcmask 7168  }
 0x25f   :  { %v851_v39 = vrot.slane %v802_v36, 4  ;;  %v852_v4 = vrot.slane %v803_v37, 4  ;;  %v654_v52 = vsel %vm1928_vm4, %v652_v45, 0.0  ;;  %vm1931_vm3 = vmmov %vm1930_vm14  ;;  %v642_v12 = vsel %vm1451_vm9, %v637_v53, 0.0 }
 0x260   :  { %v1173_v41 = vpop.permute.xlu1 %1172  ;;  %v687_v61 = vrot.slane %v654_v52, 4 }
 0x261   :  { %v865_v43 = vsel %vm1902_vm11, %v1670_v5, %v851_v39  ;;  %v866_v44 = vsel %vm1902_vm11, %v1672_v46, %v852_v4  ;;  %v641_v5 = vsel %vm1929_vm8, %v1190_v3, %v1189_v14  ;;  %v1175_v56 = vunpack.i.h.bf16 %v1173_v41  ;;  %vm1933_vm11 = vmmov %vm1932_vm5 }
 0x262   :  { %v1163_v42 = vpop.permute.xlu0 %1162  ;;  %888 = vmatpush.msrb.mxu2 %v865_v43  ;;  %908 = vmatpush.msrb.mxu3 %v866_v44  ;;  %v1174_v57 = vunpack.i.l.bf16 %v1173_v41  ;;  %v643_v63 = vsel %vm1469_vm13, %v641_v5, 0.0 }
 0x263   :  { %v1165_v48 = vunpack.i.h.bf16 %v1163_v42  ;;  %v1164_v49 = vunpack.i.l.bf16 %v1163_v42 }
 0x265   :  { %v790_v46 = vsel %vm1930_vm14, %v1164_v49, %v1165_v48  ;;  %v787_v54 = vsel %vm1931_vm3, %v1165_v48, %v1164_v49  ;;  %vm1934_vm3 = vcmask 1043456   ;;  %vm1943_vm14 = vcmp.ge.s32.totalorder %v1430_v10, 16  ;;  %v86_v48 = vld [vmem:[#allocation8] sm:$0xf] }
 0x266   :  { %v791_v11 = vsel %vm1451_vm9, %v790_v46, 0.0  ;;  %v792_v15 = vsel %vm1438_vm1, %v787_v54, 0.0  ;;  %vm1936_vm12 = vmmov %vm1934_vm3 }
 0x267   :  { %v696_v31 = vsel %vm1936_vm12, %v642_v12, %v686_v59  ;;  %vm1937_vm13 = vmmov %vm1934_vm3  ;;  %v845_v21 = vrot.slane %v791_v11, 4  ;;  %v846_v23 = vrot.slane %v792_v15, 4 }
 0x268   :  { %v658_v58 = vpop.permute.xlu1 %657  ;;  %v697_v17 = vsel %vm1937_vm13, %v643_v63, %v687_v61  ;;  %vm1941_vm0 = vmmov %vm1934_vm3 }
 0x269   :  { %v659_v9 = vsel %vm1932_vm5, %v656_v60, %v658_v58  ;;  %v663_v62 = vsel %vm1933_vm11, %v658_v58, %v656_v60  ;;  %vm1935_vm11 = vmmov %vm1934_vm3  ;;  %vm1938_vm5 = vcmask 130048  }
 0x26a   :  { %v1178_v2 = vpop.permute.xlu0 %1177  ;;  %v664_v7 = vsel %vm1442_vm2, %v659_v9, 0.0  ;;  %v665_v8 = vsel %vm1477_vm15, %v663_v62, 0.0  ;;  %v768_v19 = vsel %vm1938_vm5, %v1174_v57, %v1175_v56  ;;  %vm1939_vm15 = vcmask 121856   ;;  %vm1942_vm8 = vmmov %vm1941_vm0 }
 0x26b   :  { %v1180_v60 = vunpack.i.h.bf16 %v1178_v2  ;;  %v1179_v16 = vunpack.i.l.bf16 %v1178_v2  ;;  %1046 = vmatpush.msk.msrb.mxu0 %vm1934_vm3, %v664_v7  ;;  %1048 = vmatpush.msk.msrb.mxu1 %vm1935_vm11, %v665_v8  ;;  %vm1940_vm4 = vmmov %vm1939_vm15  ;;  %v769_v33 = vsel %vm1943_vm14, %v768_v19, 0.0  ;;  %vm1945_vm11 = vcmask 138240  }
 0x26c   :  { %vm1944_vm3 = vmmov %vm1938_vm5  ;;  %v839_v4 = vrot.slane %v769_v33, 4 }
 0x26d   :  { %719 = vmatpush.msrb.mxu0 %v696_v31  ;;  %739 = vmatpush.msrb.mxu1 %v697_v17  ;;  %v779_v32 = vsel %vm1939_vm15, %v1179_v16, %v1180_v60  ;;  %v776_v22 = vsel %vm1940_vm4, %v1180_v60, %v1179_v16  ;;  %v765_v34 = vsel %vm1944_vm3, %v1175_v56, %v1174_v57  ;;  %vm1946_vm12 = vmmov %vm1945_vm11  ;;  %vm1949_vm15 = vcmask 1039360   ;;  %v1203_v57 = vpop.permute.xlu2 %1202 }
 0x26e   :  { %v780_v24 = vsel %vm1459_vm10, %v779_v32, 0.0  ;;  %v781_v25 = vsel %vm1447_vm6, %v776_v22, 0.0  ;;  %v840_v41 = vrot.slane %v765_v34, 4  ;;  %vm1947_vm13 = vmmov %vm1941_vm0  ;;  %v1205_v12 = vunpack.i.h.bf16 %v1203_v57 }
 0x26f   :  { %v863_v29 = vsel %vm1941_vm0, %v780_v24, %v845_v21  ;;  %v864_v30 = vsel %vm1942_vm8, %v781_v25, %v846_v23  ;;  %vm1948_vm5 = vmmov %vm1941_vm0  ;;  %vm1951_vm0 = vcmask 293888   ;;  %v1204_v63 = vunpack.i.l.bf16 %v1203_v57 }
 0x270   :  { %889 = vmatpush.msrb.mxu2 %v863_v29  ;;  %909 = vmatpush.msrb.mxu3 %v864_v30  ;;  %v1193_v36 = vpop.permute.xlu1 %1192  ;;  %vm1950_vm4 = vmmov %vm1949_vm15 }
 0x271   :  { %v1195_v37 = vunpack.i.h.bf16 %v1193_v36  ;;  %v1194_v38 = vunpack.i.l.bf16 %v1193_v36  ;;  %vm1952_vm8 = vmmov %vm1951_vm0 }
 0x272   :  { %v1183_v39 = vpop.permute.xlu0 %1182  ;;  %vm1953_vm14 = vmmov %vm1948_vm5 }
 0x273   :  { %v1185_v43 = vunpack.i.h.bf16 %v1183_v39  ;;  %v1184_v44 = vunpack.i.l.bf16 %v1183_v39  ;;  %v757_v3 = vsel %vm1945_vm11, %v1194_v38, %v1195_v37  ;;  %v754_v14 = vsel %vm1946_vm12, %v1195_v37, %v1194_v38  ;;  %vm1954_vm3 = vmmov %vm1948_vm5 }
 0x274   :  { %v758_v42 = vsel %vm1551_vm7, %v757_v3, 0.0  ;;  %v759_v45 = vsel %vm1438_vm1, %v754_v14, 0.0  ;;  %vm1956_vm11 = vcmask 7168  }
 0x275   :  { %v861_v49 = vsel %vm1947_vm13, %v758_v42, %v839_v4  ;;  %v862_v51 = vsel %vm1948_vm5, %v759_v45, %v840_v41  ;;  %v626_v52 = vsel %vm1949_vm15, %v1184_v44, %v1185_v43  ;;  %v630_v53 = vsel %vm1950_vm4, %v1185_v43, %v1184_v44  ;;  %vm1958_vm13 = vmmov %vm1956_vm11 }
 0x276   :  { %890 = vmatpush.msrb.mxu2 %v861_v49  ;;  %910 = vmatpush.msrb.mxu3 %v862_v51  ;;  %v631_v5 = vsel %vm1442_vm2, %v626_v52, 0.0  ;;  %v632_v46 = vsel %vm1447_vm6, %v630_v53, 0.0  ;;  %vm1955_vm2 = vcmask 121856   ;;  %vm1959_vm5 = vcmask 130048   ;;  %vm1960_vm15 = vmmov %vm1954_vm3 }
 0x277   :  { %v680_v54 = vrot.slane %v631_v5, 4  ;;  %v681_v56 = vrot.slane %v632_v46, 4  ;;  %1051 = vmatmul.msk.f32.vlgmr.msrb.gmra.mxu2 %vm1951_vm0, %v86_v48  ;;  %1053 = vmatmul.msk.f32.vlgmr.msrb.gmra.mxu3 %vm1952_vm8, %v86_v48  ;;  %vm1957_vm12 = vmmov %vm1955_vm2  ;;  %v597_v17 = vsel %vm1959_vm5, %v1204_v63, %v1205_v12  ;;  %vm1964_vm8 = vcmask 138240  }
 0x278   :  { %v1208_v58 = vpop.permute.xlu1 %1207  ;;  %vm1961_vm4 = vmmov %vm1954_vm3 }
 0x279   :  { %v1210_v59 = vunpack.i.h.bf16 %v1208_v58  ;;  %v1209_v61 = vunpack.i.l.bf16 %v1208_v58  ;;  %v694_v9 = vsel %vm1953_vm14, %v1680_v6, %v680_v54  ;;  %v695_v20 = vsel %vm1954_vm3, %v1682_v13, %v681_v56  ;;  %vm1963_vm0 = vmmov %vm1959_vm5 }
 0x27a   :  { %v1198_v62 = vpop.permute.xlu0 %1197  ;;  %720 = vmatpush.msrb.mxu0 %v694_v9  ;;  %740 = vmatpush.msrb.mxu1 %v695_v20  ;;  %v594_v24 = vsel %vm1963_vm0, %v1205_v12, %v1204_v63  ;;  %vm1967_vm14 = vmmov %vm1954_vm3  ;;  %vm1979_vm0 = vcmp.eq.s32.totalorder %v1644_v55, 1 }
 0x27b   :  { %v1200_v2 = vunpack.i.h.bf16 %v1198_v62  ;;  %v1199_v7 = vunpack.i.l.bf16 %v1198_v62  ;;  %v608_v8 = vsel %vm1955_vm2, %v1209_v61, %v1210_v59  ;;  %v605_v15 = vsel %vm1957_vm12, %v1210_v59, %v1209_v61 }
 0x27c   :  { %v609_v19 = vsel %vm1459_vm10, %v608_v8, 0.0  ;;  %v610_v32 = vsel %vm1447_vm6, %v605_v15, 0.0  ;;  %vm1965_vm10 = vmmov %vm1964_vm8  ;;  %v669_v33 = vrot.slane %v594_v24, 4  ;;  %v960_v8 = vstv %s1054_s20 }
 0x27d   :  { %v619_v11 = vsel %vm1956_vm11, %v1199_v7, %v1200_v2  ;;  %v616_v60 = vsel %vm1958_vm13, %v1200_v2, %v1199_v7  ;;  %vm1966_vm6 = vmmov %vm1954_vm3  ;;  %vm1968_vm3 = vcmask 293888   ;;  %v979_v24 = vstv %s1060_s26 }
 0x27e   :  { %v620_v6 = vsel %vm1451_vm9, %v619_v11, 0.0  ;;  %v621_v13 = vsel %vm1438_vm1, %v616_v60, 0.0  ;;  %vm1962_vm9 = vcmp.ge.s32.totalorder %v1430_v10, 16  ;;  %vm1969_vm2 = vmmov %vm1968_vm3  ;;  %v963_v60 = vstv %s1055_s21 }
 0x27f   :  { %v674_v16 = vrot.slane %v620_v6, 4  ;;  %v675_v31 = vrot.slane %v621_v13, 4  ;;  %v598_v27 = vsel %vm1962_vm9, %v597_v17, 0.0  ;;  %vm1970_vm11 = vmmov %vm1961_vm4  ;;  %vm1978_vm9 = vcmp.eq.s32.totalorder %v1644_v55, 0 }
 0x280   :  { %v668_v30 = vrot.slane %v598_v27, 4  ;;  %v961_v15 = vsel %vm1978_vm9, %v960_v8, 0.0  ;;  %v973_v13 = vstv %s1058_s22 }
 0x281   :  { %v692_v21 = vsel %vm1960_vm15, %v609_v19, %v674_v16  ;;  %v693_v22 = vsel %vm1961_vm4, %v610_v32, %v675_v31  ;;  %v966_v16 = vstv %s1056_s23  ;;  %v976_v19 = vstv %s1059_s24 }
 0x282   :  { %v1213_v23 = vpop.permute.xlu0 %1212  ;;  %721 = vmatpush.msrb.mxu0 %v692_v21  ;;  %741 = vmatpush.msrb.mxu1 %v693_v22  ;;  %v969_v22 = vstv %s1057_s25 }
 0x283   :  { %v1215_v25 = vunpack.i.h.bf16 %v1213_v23  ;;  %v1214_v29 = vunpack.i.l.bf16 %v1213_v23 }
 0x285   :  { %v586_v28 = vsel %vm1964_vm8, %v1214_v29, %v1215_v25  ;;  %v583_v26 = vsel %vm1965_vm10, %v1215_v25, %v1214_v29  ;;  %vm1980_vm8 = vmmov %vm1978_vm9  ;;  %vm1981_vm10 = vcmp.eq.s32.totalorder %v1644_v55, 2 }
 0x286   :  { %v587_v34 = vsel %vm1551_vm7, %v586_v28, 0.0  ;;  %v588_v36 = vsel %vm1438_vm1, %v583_v26, 0.0  ;;  %vm1971_vm7 = vmmov %vm1961_vm4  ;;  %v974_v17 = vsel %vm1980_vm8, %v973_v13, 0.0 }
 0x287   :  { %v690_v37 = vsel %vm1966_vm6, %v587_v34, %v668_v30  ;;  %v691_v10 = vsel %vm1967_vm14, %v588_v36, %v669_v33  ;;  %vm1972_vm1 = vmmov %vm1961_vm4  ;;  %v982_v30 = vstv %s1061_s27 }
 0x288   :  { %722 = vmatpush.msrb.mxu0 %v690_v37  ;;  %742 = vmatpush.msrb.mxu1 %v691_v10  ;;  %vm1973_vm12 = vmmov %vm1972_vm1 }
 0x289   :  { %1047 = vmatmul.msk.f32.vlgmr.msrb.gmra.mxu0 %vm1968_vm3, %v86_v48  ;;  %1049 = vmatmul.msk.f32.vlgmr.msrb.gmra.mxu1 %vm1969_vm2, %v86_v48  ;;  %vm1974_vm13 = vmmov %vm1972_vm1  ;;  %vm1983_vm3 = vcmp.eq.s32.totalorder %v1644_v55, 3 }
 0x28a   :  { %vm1975_vm5 = vmmov %vm1972_vm1 }
 0x28b   :  { %vm1976_vm15 = vmmov %vm1972_vm1 }
 0x28c   :  { %vm1977_vm4 = vmmov %vm1972_vm1 }
 0x28d   :  { %vm1982_vm14 = vmmov %vm1979_vm0 }
 0x28e   :  { %v977_v27 = vsel %vm1982_vm14, %v976_v19, %v974_v17 }
 0x2fa   :  { %v1824_v38 = vpop.f32.mrf.mxu2  ;;  %v1826_v39 = vpop.f32.mrf.mxu3 }
 0x2fb   :  { %v921_v50 = vsel %vm1970_vm11, %v1824_v38, 0.0  ;;  %v922_v18 = vsel %vm1971_vm7, %v1826_v39, 0.0  ;;  %v935_v44 = vmul.f32 %v1824_v38, %v1824_v38  ;;  %v936_v3 = vmul.f32 %v1826_v39, %v1826_v39  ;;  %vm1984_vm7 = vmmov %vm1981_vm10 }
 0x2fc   :  { %v923_v4 = vadd.f32 %v922_v18, %v921_v50  ;;  %v980_v28 = vsel %vm1984_vm7, %v979_v24, %v977_v27 }
 0x2fd   :  { %v937_v5 = vsel %vm1976_vm15, %v935_v44, 0.0  ;;  %v938_v46 = vsel %vm1977_vm4, %v936_v3, 0.0 }
 0x2fe   :  { %924 = vadd.xlane.f32.xlu1 %v923_v4  ;;  %v939_v54 = vadd.f32 %v938_v46, %v937_v5 }
 0x306   :  { %v1832_v41 = vpop.f32.mrf.mxu0  ;;  %v1834_v43 = vpop.f32.mrf.mxu1 }
 0x307   :  { %v915_v14 = vsel %vm1972_vm1, %v1832_v41, 0.0  ;;  %v927_v42 = vmul.f32 %v1832_v41, %v1832_v41  ;;  %v916_v45 = vsel %vm1973_vm12, %v1834_v43, 0.0  ;;  %v928_v48 = vmul.f32 %v1834_v43, %v1834_v43  ;;  %vm1985_vm1 = vmmov %vm1983_vm3 }
 0x308   :  { %v917_v49 = vadd.f32 %v916_v45, %v915_v14  ;;  %v983_v34 = vsel %vm1985_vm1, %v982_v30, %v980_v28  ;;  %v1222_v45 = vld [vmem:[#allocation2] sm:$0xf]  ;;  %vm1986_vm12 = vmmov %vm1977_vm4 }
 0x309   :  { %v929_v51 = vsel %vm1974_vm13, %v927_v42, 0.0  ;;  %v930_v52 = vsel %vm1975_vm5, %v928_v48, 0.0  ;;  %vm1987_vm13 = vmmov %vm1977_vm4 }
 0x30a   :  { %918 = vadd.xlane.f32.xlu2 %v917_v49  ;;  %v931_v53 = vadd.f32 %v930_v52, %v929_v51  ;;  %v1223_v49 = vld [vmem:[#allocation2 + $0x8] sm:$0xf] }
 0x30c   :  { %932 = vadd.xlane.f32.xlu0 %v931_v53 }
 0x312   :  { %940 = vadd.xlane.f32.xlu2 %v939_v54 }
 0x371   :  { %v925_v56 = vpop.xlane.xlu1 %924 }
 0x37d   :  { %v919_v57 = vpop.xlane.xlu2 %918 }
 0x37e   :  { %v926_v58 = vadd.f32 %v925_v56, %v919_v57 }
 0x37f   :  { %v933_v61 = vpop.xlane.xlu0 %932 }
 0x380   :  { %v943_v59 = vmul.f32 %v926_v58, %v1639_v47 }
 0x382   :  { %v945_v62 = vmul.f32 %v943_v59, %v943_v59 }
 0x385   :  { %v941_v9 = vpop.xlane.xlu2 %940 }
 0x386   :  { %v942_v20 = vadd.f32 %v941_v9, %v933_v61 }
 0x388   :  { %v944_v12 = vmul.f32 %v942_v20, %v1639_v47  ;;  %v964_v47 = vsel %vm1979_vm0, %v963_v60, %v961_v15 }
 0x389   :  { %v967_v21 = vsel %vm1981_vm10, %v966_v16, %v964_v47 }
 0x38a   :  { %v946_v63 = vsub.f32 %v944_v12, %v945_v62  ;;  %v970_v25 = vsel %vm1983_vm3, %v969_v22, %v967_v21 }
 0x38c   :  { %v947_v2 = vmax.f32 %v946_v63, 0.0 }
 0x38e   :  { %v948_v7 = vadd.f32 1e-05, %v947_v2 }
 0x390   :  { %1220 = vrsqrt.f32 %v948_v7  ;;  %vm955_vm2 = vweird.f32 %v948_v7 }
 0x396   :  { %v1221_v11 = vpop.eup %1220 }
 0x397   :  { %v950_v6 = vmul.f32 %v1221_v11, %v948_v7  ;;  %vm956_vm6 = vweird.f32 %v1221_v11 }
 0x398   :  { %vm957_vm11 = vmor %vm955_vm2, %vm956_vm6 }
 0x399   :  { %v951_v31 = vmul.f32 %v1221_v11, %v950_v6 }
 0x39b   :  { %v952_v32 = vmul.f32 0.5, %v951_v31 }
 0x39d   :  { %v953_v23 = vsub.f32 1.5, %v952_v32 }
 0x39f   :  { %v954_v29 = vmul.f32 %v1221_v11, %v953_v23 }
 0x3a1   :  { %v958_v26 = vsel %vm957_vm11, %v1221_v11, %v954_v29 }
 0x3a2   :  { %v971_v33 = vmul.f32 %v970_v25, %v958_v26 }
 0x3a4   :  { %v984_v36 = vmul.f32 %v971_v33, %v943_v59  ;;  %v986_v37 = vmul.f32 %v971_v33, %v1832_v41  ;;  %v987_v50 = vmul.f32 %v971_v33, %v1834_v43  ;;  %v994_v18 = vmul.f32 %v971_v33, %v1824_v38 }
 0x3a5   :  { %v995_v4 = vmul.f32 %v971_v33, %v1826_v39 }
 0x3a6   :  { %v985_v10 = vsub.f32 %v983_v34, %v984_v36 }
 0x3a8   :  { %v988_v44 = vadd.f32 %v986_v37, %v985_v10  ;;  %v989_v3 = vadd.f32 %v987_v50, %v985_v10  ;;  %v996_v14 = vadd.f32 %v994_v18, %v985_v10  ;;  %v997_v42 = vadd.f32 %v995_v4, %v985_v10 }
 0x3aa   :  { %v990_v48 = vadd.f32 %v1222_v45, %v988_v44  ;;  %v991_v51 = vadd.f32 %v1223_v49, %v989_v3  ;;  %v998_v55 = vadd.f32 %v996_v14, %v414_v35  ;;  %v999_v41 = vadd.f32 %v997_v42, %v415_v40 }
 0x3ac   :  { %v1000_v52 = vmax.f32 %v998_v55, 0.0  ;;  %v1001_v43 = vmax.f32 %v999_v41, 0.0  ;;  %v992_v38 = vmax.f32 %v990_v48, 0.0  ;;  %v993_v39 = vmax.f32 %v991_v51, 0.0 }
 0x3ae   :  { %v1004_v53 = vrot.slane %v1000_v52, 4  ;;  %v1005_v5 = vrot.slane %v1001_v43, 4 }
 0x3b0   :  { %v1008_v46 = vsel %vm1986_vm12, %v992_v38, %v1004_v53  ;;  %v1009_v0 = vsel %vm1987_vm13, %v993_v39, %v1005_v5 }
 0x3b1   :  { %1010 = vst [vmem:[#allocation10] sm:$0xff] %v1008_v46 }
 0x3b2   :  { %1011 = vst [vmem:[#allocation10 + $0x8] sm:$0xff] %v1009_v0 }
 0x3b3   :  { %1022 = dma.vmem_to_hbm [thread:$0]  %s1018_s28, 256, %s1020_s5, [#allocation4]  }
 0x3b4   :  { %1338 = dma.done.wait [#allocation4], 256  }
 0x3b5   :  { %1339 = vsyncadd [#allocation4], 4294967040 }
 0x3b6   :  { %1027 = vsyncpa [#allocation3], 1 }
 0x3b7   :  { %1028 = vsyncpa [#allocation7], 1 }
 0x3b8   :  { %1029 = vsyncpa [#allocation4], 1 }
 0x3b9   :  { %1030 = vsyncpa [#allocation5], 1 }

</bundles_post_ra>
